<compile_context>
chip_gen: v6e
topology: v6e:2x2x1
jax: 0.10.0
libtpu: 0.0.40
codegen_flags: <defaults>
</compile_context>

<pallas_src>
import functools

import jax
import jax.numpy as jnp
from jax.experimental import pallas as pl
from jax.experimental.pallas import tpu as pltpu


# ---------------------------------------------------------------------------
# Phase A / C: batched matmul + bias:  out = x @ w + b   (row-tiled, parallel)
# ---------------------------------------------------------------------------
def matmul_bias_kernel(x_ref, w_ref, b_ref, o_ref):
    acc = jnp.dot(x_ref[...], w_ref[...], preferred_element_type=jnp.float32)
    o_ref[...] = (acc + b_ref[...]).astype(o_ref.dtype)


def matmul_bias(x, w, b, *, out_dtype=jnp.float32, matmul_dtype=None, row_block=256):
    """x: (M, K), w: (K, N), b: (1, N) -> (M, N).  Full K/N per block (fine at these
    sizes); at production D_in ~ 10000 a K-reduction grid axis + f32 VMEM accumulator
    would be added and vmem_limit_bytes budgeted for v7x's 64 MiB."""
    M, K = x.shape
    N = w.shape[1]
    if matmul_dtype is not None:
        x = x.astype(matmul_dtype)     # bf16 operands, f32 accumulate
        w = w.astype(matmul_dtype)
    b = b.astype(jnp.float32)

    # Row tile: multiple of 8 sublanes when possible, otherwise the full (small) M.
    tm = row_block if (M % row_block == 0 and row_block % 8 == 0) else M
    grid = (M // tm,)

    return pl.pallas_call(
        matmul_bias_kernel,
        out_shape=jax.ShapeDtypeStruct((M, N), out_dtype),
        grid_spec=pltpu.PrefetchScalarGridSpec(
            num_scalar_prefetch=0,
            grid=grid,
            in_specs=[
                pl.BlockSpec((tm, K), lambda i: (i, 0)),   # activations
                pl.BlockSpec((K, N), lambda i: (0, 0)),    # weight (pre-transposed)
                pl.BlockSpec((1, N), lambda i: (0, 0)),    # bias
            ],
            out_specs=pl.BlockSpec((tm, N), lambda i: (i, 0)),
        ),
        compiler_params=pltpu.CompilerParams(
            dimension_semantics=("parallel",)),            # rows are independent
    )(x, w, b)


# ---------------------------------------------------------------------------
# Phase B: recurrence  h_t = tanh(z_t + h_{t-1} @ W_hh^T), Tt steps per grid step
# ---------------------------------------------------------------------------
def rnn_recurrence_kernel(z_ref, h0_ref, whh_ref, h_all_ref, h_scr):
    i = pl.program_id(0)

    @pl.when(i == 0)
    def _():
        h_scr[...] = h0_ref[...]

    h = h_scr[...]              # (B, H) f32 — carried in vregs inside the block
    w = whh_ref[...]            # (H, H), possibly bf16 (f32 accumulation below)
    z = z_ref[...]              # (B, Tt, H) f32, one dense load per block

    n_steps = z_ref.shape[1]    # static Python int -> fully unrolled inner loop
    for j in range(n_steps):
        h = jnp.tanh(
            z[:, j, :]
            + jnp.dot(h.astype(w.dtype), w, preferred_element_type=jnp.float32))
        h_all_ref[j] = h        # store along leading (time) axis of the block

    h_scr[...] = h              # carry hidden state to the next time-block


@functools.partial(jax.jit, static_argnames=("time_block", "matmul_dtype"))
def rnn_forward(x, h_state, wih, whh, b, wout, bout, *,
                time_block=8, matmul_dtype=None):
    """x: (B, T, D_in) batch-first; h_state: (1, B, H).
    Weights are pre-transposed: wih (D_in, H), whh (H, H), wout (H, D_out);
    b = b_ih + b_hh with shape (1, H); bout (1, D_out)."""
    B, T, D_in = x.shape
    H = whh.shape[0]
    D_out = wout.shape[1]

    # ---- Phase A: hoisted input projection as ONE dense batched matmul.
    z = matmul_bias(x.reshape(B * T, D_in), wih, b,
                    matmul_dtype=matmul_dtype).reshape(B, T, H)

    # ---- Phase B: sequential recurrence, time-blocked.
    if T % time_block == 0 and time_block % 8 == 0:
        Tt = time_block
    else:
        Tt = T                                      # single block (equal-full-dim is legal)
    h0 = h_state.reshape(B, H).astype(jnp.float32)
    whh_mm = whh.astype(matmul_dtype) if matmul_dtype is not None else whh

    h_all_tm = pl.pallas_call(
        rnn_recurrence_kernel,
        out_shape=jax.ShapeDtypeStruct((T, B, H), jnp.float32),
        grid_spec=pltpu.PrefetchScalarGridSpec(
            num_scalar_prefetch=0,
            grid=(T // Tt,),
            in_specs=[
                pl.BlockSpec((B, Tt, H), lambda i: (0, i, 0)),   # z, batch-first
                pl.BlockSpec((B, H), lambda i: (0, 0)),          # h0
                pl.BlockSpec((H, H), lambda i: (0, 0)),          # W_hh^T
            ],
            out_specs=pl.BlockSpec((Tt, B, H), lambda i: (i, 0, 0)),  # hidden states
            scratch_shapes=[pltpu.VMEM((B, H), jnp.float32)],    # h carry across blocks
        ),
        compiler_params=pltpu.CompilerParams(
            dimension_semantics=("arbitrary",)),   # time carries state -> sequential
    )(z, h0, whh_mm)

    # ---- Phase C: hoisted output projection as ONE dense batched matmul.
    # h_all is only H wide, so this transpose is cheap (unlike transposing x / out).
    h_all = jnp.transpose(h_all_tm, (1, 0, 2)).reshape(B * T, H)
    out = matmul_bias(h_all, wout, bout,
                      matmul_dtype=matmul_dtype).reshape(B, T, D_out)

    hT = h_all_tm[-1][None]                        # (1, B, H) like PyTorch h_state
    return out.astype(x.dtype), hT


# ---------------------------------------------------------------------------
# Pure-JAX reference (lax.scan) mirroring PyTorch semantics, all f32.
# ---------------------------------------------------------------------------
def reference_forward(x, h_state, wih, whh, b, wout, bout):
    B, T, _ = x.shape
    H = whh.shape[0]
    h0 = h_state.reshape(B, H)

    def step(h, x_t):
        h_new = jnp.tanh(x_t @ wih + h @ whh + b)
        return h_new, h_new @ wout + bout

    hT, outs = jax.lax.scan(step, h0, jnp.transpose(x, (1, 0, 2)))
    return jnp.transpose(outs, (1, 0, 2)), hT[None]


if __name__ == "__main__":
    # Small shapes consistent with the module (scaled down from 10000/100/1000).
    B, T = 2, 16
    D_IN, H, D_OUT = 256, 128, 256

    key = jax.random.PRNGKey(0)
    kx, k0, k1, k2, k3, k4, k5 = jax.random.split(key, 7)

    # PyTorch default init: U(-1/sqrt(H), 1/sqrt(H)) for RNN and Linear params.
    bnd = 1.0 / jnp.sqrt(jnp.float32(H))
    wih = jax.random.uniform(k0, (D_IN, H), jnp.float32, -bnd, bnd)     # W_ih^T
    whh = jax.random.uniform(k1, (H, H), jnp.float32, -bnd, bnd)        # W_hh^T
    b_ih = jax.random.uniform(k2, (H,), jnp.float32, -bnd, bnd)
    b_hh = jax.random.uniform(k3, (H,), jnp.float32, -bnd, bnd)
    b = (b_ih + b_hh)[None, :]                                          # (1, H)
    wout = jax.random.uniform(k4, (H, D_OUT), jnp.float32, -bnd, bnd)   # W_out^T
    bout = jax.random.uniform(k5, (D_OUT,), jnp.float32, -bnd, bnd)[None, :]

    x = jax.random.normal(kx, (B, T, D_IN), jnp.float32)
    h_state = jnp.zeros((1, B, H), jnp.float32)    # h_state=None in PyTorch -> zeros

    out_ref, hT_ref = reference_forward(x, h_state, wih, whh, b, wout, bout)

    # f32 path: tight check against the pure-JAX reference.
    out, hT = rnn_forward(x, h_state, wih, whh, b, wout, bout,
                          time_block=8, matmul_dtype=None)
    out = jax.block_until_ready(out)
    hT = jax.block_until_ready(hT)
    assert out.shape == (B, T, D_OUT) and hT.shape == (1, B, H)
    assert jnp.allclose(out, out_ref, atol=1e-4, rtol=1e-4)
    assert jnp.allclose(hT, hT_ref, atol=1e-4, rtol=1e-4)

    # bf16-operand / f32-accumulate fast path (v6e/v7x MXU; elementwise stays f32).
    out16, hT16 = rnn_forward(x, h_state, wih, whh, b, wout, bout,
                              time_block=8, matmul_dtype=jnp.bfloat16)
    out16 = jax.block_until_ready(out16)
    hT16 = jax.block_until_ready(hT16)
    assert jnp.allclose(out16, out_ref, atol=5e-2, rtol=5e-2)
    assert jnp.allclose(hT16, hT_ref, atol=5e-2, rtol=5e-2)

    print("KERNEL_OK")
</pallas_src>

<mosaic_0001>
module attributes {stable_mosaic.version = 11 : i64} {
  func.func @rnn_recurrence_kernel(%arg0: i32, %arg1: memref<2x8x128xf32, #tpu.memory_space<vmem>>, %arg2: memref<2x128xf32, #tpu.memory_space<vmem>>, %arg3: memref<128x128xf32, #tpu.memory_space<vmem>>, %arg4: memref<8x2x128xf32, #tpu.memory_space<vmem>>, %arg5: memref<2x128xf32, #tpu.memory_space<vmem>>) attributes {dimension_semantics = [#tpu.dimension_semantics<arbitrary>], iteration_bounds = array<i64: 2>, scalar_prefetch = 0 : i64, scratch_operands = 1 : i64, tpu.core_type = #tpu.core_type<tc>, window_params = [{transform_indices = @transform_0, window_bounds = array<i64: 2, 8, 128>}, {pipeline_mode = #tpu.pipeline_mode<synchronous>, transform_indices = @transform_1, window_bounds = array<i64: 2, 128>}, {pipeline_mode = #tpu.pipeline_mode<synchronous>, transform_indices = @transform_2, window_bounds = array<i64: 128, 128>}, {transform_indices = @transform_3, window_bounds = array<i64: 8, 2, 128>}]} {
    %c0_i32 = arith.constant 0 : i32
    %0 = arith.cmpi eq, %arg0, %c0_i32 : i32
    %1 = arith.extui %0 : i1 to i32
    %c0_i32_0 = arith.constant 0 : i32
    %2 = arith.cmpi ne, %1, %c0_i32_0 : i32
    scf.if %2 {
      %c0_33 = arith.constant 0 : index
      %c0_34 = arith.constant 0 : index
      %71 = vector.load %arg2[%c0_33, %c0_34] : memref<2x128xf32, #tpu.memory_space<vmem>>, vector<2x128xf32>
      %c0_35 = arith.constant 0 : index
      %c0_36 = arith.constant 0 : index
      %72 = vector.load %arg5[%c0_35, %c0_36] : memref<2x128xf32, #tpu.memory_space<vmem>>, vector<2x128xf32>
      tpu.vector_store %arg5[%c0_35, %c0_36], %71 {strides = array<i32>} : memref<2x128xf32, #tpu.memory_space<vmem>>, vector<2x128xf32>,
    } else {
    }
    %c0 = arith.constant 0 : index
    %c0_1 = arith.constant 0 : index
    %3 = vector.load %arg5[%c0, %c0_1] : memref<2x128xf32, #tpu.memory_space<vmem>>, vector<2x128xf32>
    %c0_2 = arith.constant 0 : index
    %c0_3 = arith.constant 0 : index
    %4 = vector.load %arg3[%c0_2, %c0_3] : memref<128x128xf32, #tpu.memory_space<vmem>>, vector<128x128xf32>
    %c0_4 = arith.constant 0 : index
    %c0_5 = arith.constant 0 : index
    %c0_6 = arith.constant 0 : index
    %5 = vector.load %arg1[%c0_4, %c0_5, %c0_6] : memref<2x8x128xf32, #tpu.memory_space<vmem>>, vector<2x8x128xf32>
    %6 = vector.extract_strided_slice %5 {offsets = [0, 0, 0], sizes = [2, 1, 128], strides = [1, 1, 1]} : vector<2x8x128xf32> to vector<2x1x128xf32>
    %7 = vector.shape_cast %6 : vector<2x1x128xf32> to vector<2x128xf32>
    %cst = arith.constant dense<0.000000e+00> : vector<2x128xf32>
    %8 = tpu.matmul %3, %4, %cst {dimension_numbers = #tpu.dot_dimension_numbers<[1], [0], [0], [1], [0, 0, 1, 1], [], []>} : vector<2x128xf32>, vector<128x128xf32>, vector<2x128xf32> -> vector<2x128xf32>
    %9 = arith.addf %7, %8 : vector<2x128xf32>
    %10 = math.tanh %9 : vector<2x128xf32>
    %c0_7 = arith.constant 0 : index
    %c0_8 = arith.constant 0 : index
    %c0_9 = arith.constant 0 : index
    %11 = vector.load %arg4[%c0_7, %c0_8, %c0_9] : memref<8x2x128xf32, #tpu.memory_space<vmem>>, vector<1x2x128xf32>
    %12 = vector.shape_cast %11 : vector<1x2x128xf32> to vector<2x128xf32>
    %13 = vector.shape_cast %10 : vector<2x128xf32> to vector<1x2x128xf32>
    tpu.vector_store %arg4[%c0_7, %c0_8, %c0_9], %13 {strides = array<i32>} : memref<8x2x128xf32, #tpu.memory_space<vmem>>, vector<1x2x128xf32>,
    %14 = vector.extract_strided_slice %5 {offsets = [0, 1, 0], sizes = [2, 1, 128], strides = [1, 1, 1]} : vector<2x8x128xf32> to vector<2x1x128xf32>
    %15 = vector.shape_cast %14 : vector<2x1x128xf32> to vector<2x128xf32>
    %cst_10 = arith.constant dense<0.000000e+00> : vector<2x128xf32>
    %16 = tpu.matmul %10, %4, %cst_10 {dimension_numbers = #tpu.dot_dimension_numbers<[1], [0], [0], [1], [0, 0, 1, 1], [], []>} : vector<2x128xf32>, vector<128x128xf32>, vector<2x128xf32> -> vector<2x128xf32>
    %17 = arith.addf %15, %16 : vector<2x128xf32>
    %18 = math.tanh %17 : vector<2x128xf32>
    %c1 = arith.constant 1 : index
    %c0_11 = arith.constant 0 : index
    %c0_12 = arith.constant 0 : index
    %19 = vector.load %arg4[%c1, %c0_11, %c0_12] : memref<8x2x128xf32, #tpu.memory_space<vmem>>, vector<1x2x128xf32>
    %20 = vector.shape_cast %19 : vector<1x2x128xf32> to vector<2x128xf32>
    %21 = vector.shape_cast %18 : vector<2x128xf32> to vector<1x2x128xf32>
    tpu.vector_store %arg4[%c1, %c0_11, %c0_12], %21 {strides = array<i32>} : memref<8x2x128xf32, #tpu.memory_space<vmem>>, vector<1x2x128xf32>,
    %22 = vector.extract_strided_slice %5 {offsets = [0, 2, 0], sizes = [2, 1, 128], strides = [1, 1, 1]} : vector<2x8x128xf32> to vector<2x1x128xf32>
    %23 = vector.shape_cast %22 : vector<2x1x128xf32> to vector<2x128xf32>
    %cst_13 = arith.constant dense<0.000000e+00> : vector<2x128xf32>
    %24 = tpu.matmul %18, %4, %cst_13 {dimension_numbers = #tpu.dot_dimension_numbers<[1], [0], [0], [1], [0, 0, 1, 1], [], []>} : vector<2x128xf32>, vector<128x128xf32>, vector<2x128xf32> -> vector<2x128xf32>
    %25 = arith.addf %23, %24 : vector<2x128xf32>
    %26 = math.tanh %25 : vector<2x128xf32>
    %c2 = arith.constant 2 : index
    %c0_14 = arith.constant 0 : index
    %c0_15 = arith.constant 0 : index
    %27 = vector.load %arg4[%c2, %c0_14, %c0_15] : memref<8x2x128xf32, #tpu.memory_space<vmem>>, vector<1x2x128xf32>
    %28 = vector.shape_cast %27 : vector<1x2x128xf32> to vector<2x128xf32>
    %29 = vector.shape_cast %26 : vector<2x128xf32> to vector<1x2x128xf32>
    tpu.vector_store %arg4[%c2, %c0_14, %c0_15], %29 {strides = array<i32>} : memref<8x2x128xf32, #tpu.memory_space<vmem>>, vector<1x2x128xf32>,
    %30 = vector.extract_strided_slice %5 {offsets = [0, 3, 0], sizes = [2, 1, 128], strides = [1, 1, 1]} : vector<2x8x128xf32> to vector<2x1x128xf32>
    %31 = vector.shape_cast %30 : vector<2x1x128xf32> to vector<2x128xf32>
    %cst_16 = arith.constant dense<0.000000e+00> : vector<2x128xf32>
    %32 = tpu.matmul %26, %4, %cst_16 {dimension_numbers = #tpu.dot_dimension_numbers<[1], [0], [0], [1], [0, 0, 1, 1], [], []>} : vector<2x128xf32>, vector<128x128xf32>, vector<2x128xf32> -> vector<2x128xf32>
    %33 = arith.addf %31, %32 : vector<2x128xf32>
    %34 = math.tanh %33 : vector<2x128xf32>
    %c3 = arith.constant 3 : index
    %c0_17 = arith.constant 0 : index
    %c0_18 = arith.constant 0 : index
    %35 = vector.load %arg4[%c3, %c0_17, %c0_18] : memref<8x2x128xf32, #tpu.memory_space<vmem>>, vector<1x2x128xf32>
    %36 = vector.shape_cast %35 : vector<1x2x128xf32> to vector<2x128xf32>
    %37 = vector.shape_cast %34 : vector<2x128xf32> to vector<1x2x128xf32>
    tpu.vector_store %arg4[%c3, %c0_17, %c0_18], %37 {strides = array<i32>} : memref<8x2x128xf32, #tpu.memory_space<vmem>>, vector<1x2x128xf32>,
    %38 = vector.extract_strided_slice %5 {offsets = [0, 4, 0], sizes = [2, 1, 128], strides = [1, 1, 1]} : vector<2x8x128xf32> to vector<2x1x128xf32>
    %39 = vector.shape_cast %38 : vector<2x1x128xf32> to vector<2x128xf32>
    %cst_19 = arith.constant dense<0.000000e+00> : vector<2x128xf32>
    %40 = tpu.matmul %34, %4, %cst_19 {dimension_numbers = #tpu.dot_dimension_numbers<[1], [0], [0], [1], [0, 0, 1, 1], [], []>} : vector<2x128xf32>, vector<128x128xf32>, vector<2x128xf32> -> vector<2x128xf32>
    %41 = arith.addf %39, %40 : vector<2x128xf32>
    %42 = math.tanh %41 : vector<2x128xf32>
    %c4 = arith.constant 4 : index
    %c0_20 = arith.constant 0 : index
    %c0_21 = arith.constant 0 : index
    %43 = vector.load %arg4[%c4, %c0_20, %c0_21] : memref<8x2x128xf32, #tpu.memory_space<vmem>>, vector<1x2x128xf32>
    %44 = vector.shape_cast %43 : vector<1x2x128xf32> to vector<2x128xf32>
    %45 = vector.shape_cast %42 : vector<2x128xf32> to vector<1x2x128xf32>
    tpu.vector_store %arg4[%c4, %c0_20, %c0_21], %45 {strides = array<i32>} : memref<8x2x128xf32, #tpu.memory_space<vmem>>, vector<1x2x128xf32>,
    %46 = vector.extract_strided_slice %5 {offsets = [0, 5, 0], sizes = [2, 1, 128], strides = [1, 1, 1]} : vector<2x8x128xf32> to vector<2x1x128xf32>
    %47 = vector.shape_cast %46 : vector<2x1x128xf32> to vector<2x128xf32>
    %cst_22 = arith.constant dense<0.000000e+00> : vector<2x128xf32>
    %48 = tpu.matmul %42, %4, %cst_22 {dimension_numbers = #tpu.dot_dimension_numbers<[1], [0], [0], [1], [0, 0, 1, 1], [], []>} : vector<2x128xf32>, vector<128x128xf32>, vector<2x128xf32> -> vector<2x128xf32>
    %49 = arith.addf %47, %48 : vector<2x128xf32>
    %50 = math.tanh %49 : vector<2x128xf32>
    %c5 = arith.constant 5 : index
    %c0_23 = arith.constant 0 : index
    %c0_24 = arith.constant 0 : index
    %51 = vector.load %arg4[%c5, %c0_23, %c0_24] : memref<8x2x128xf32, #tpu.memory_space<vmem>>, vector<1x2x128xf32>
    %52 = vector.shape_cast %51 : vector<1x2x128xf32> to vector<2x128xf32>
    %53 = vector.shape_cast %50 : vector<2x128xf32> to vector<1x2x128xf32>
    tpu.vector_store %arg4[%c5, %c0_23, %c0_24], %53 {strides = array<i32>} : memref<8x2x128xf32, #tpu.memory_space<vmem>>, vector<1x2x128xf32>,
    %54 = vector.extract_strided_slice %5 {offsets = [0, 6, 0], sizes = [2, 1, 128], strides = [1, 1, 1]} : vector<2x8x128xf32> to vector<2x1x128xf32>
    %55 = vector.shape_cast %54 : vector<2x1x128xf32> to vector<2x128xf32>
    %cst_25 = arith.constant dense<0.000000e+00> : vector<2x128xf32>
    %56 = tpu.matmul %50, %4, %cst_25 {dimension_numbers = #tpu.dot_dimension_numbers<[1], [0], [0], [1], [0, 0, 1, 1], [], []>} : vector<2x128xf32>, vector<128x128xf32>, vector<2x128xf32> -> vector<2x128xf32>
    %57 = arith.addf %55, %56 : vector<2x128xf32>
    %58 = math.tanh %57 : vector<2x128xf32>
    %c6 = arith.constant 6 : index
    %c0_26 = arith.constant 0 : index
    %c0_27 = arith.constant 0 : index
    %59 = vector.load %arg4[%c6, %c0_26, %c0_27] : memref<8x2x128xf32, #tpu.memory_space<vmem>>, vector<1x2x128xf32>
    %60 = vector.shape_cast %59 : vector<1x2x128xf32> to vector<2x128xf32>
    %61 = vector.shape_cast %58 : vector<2x128xf32> to vector<1x2x128xf32>
    tpu.vector_store %arg4[%c6, %c0_26, %c0_27], %61 {strides = array<i32>} : memref<8x2x128xf32, #tpu.memory_space<vmem>>, vector<1x2x128xf32>,
    %62 = vector.extract_strided_slice %5 {offsets = [0, 7, 0], sizes = [2, 1, 128], strides = [1, 1, 1]} : vector<2x8x128xf32> to vector<2x1x128xf32>
    %63 = vector.shape_cast %62 : vector<2x1x128xf32> to vector<2x128xf32>
    %cst_28 = arith.constant dense<0.000000e+00> : vector<2x128xf32>
    %64 = tpu.matmul %58, %4, %cst_28 {dimension_numbers = #tpu.dot_dimension_numbers<[1], [0], [0], [1], [0, 0, 1, 1], [], []>} : vector<2x128xf32>, vector<128x128xf32>, vector<2x128xf32> -> vector<2x128xf32>
    %65 = arith.addf %63, %64 : vector<2x128xf32>
    %66 = math.tanh %65 : vector<2x128xf32>
    %c7 = arith.constant 7 : index
    %c0_29 = arith.constant 0 : index
    %c0_30 = arith.constant 0 : index
    %67 = vector.load %arg4[%c7, %c0_29, %c0_30] : memref<8x2x128xf32, #tpu.memory_space<vmem>>, vector<1x2x128xf32>
    %68 = vector.shape_cast %67 : vector<1x2x128xf32> to vector<2x128xf32>
    %69 = vector.shape_cast %66 : vector<2x128xf32> to vector<1x2x128xf32>
    tpu.vector_store %arg4[%c7, %c0_29, %c0_30], %69 {strides = array<i32>} : memref<8x2x128xf32, #tpu.memory_space<vmem>>, vector<1x2x128xf32>,
    %c0_31 = arith.constant 0 : index
    %c0_32 = arith.constant 0 : index
    %70 = vector.load %arg5[%c0_31, %c0_32] : memref<2x128xf32, #tpu.memory_space<vmem>>, vector<2x128xf32>
    tpu.vector_store %arg5[%c0_31, %c0_32], %66 {strides = array<i32>} : memref<2x128xf32, #tpu.memory_space<vmem>>, vector<2x128xf32>,
    return
  }
  func.func @transform_0(%arg0: i32) -> (i32, i32, i32) {
    %c0_i32 = arith.constant 0 : i32
    %c0_i32_0 = arith.constant 0 : i32
    %c0_i32_1 = arith.constant 0 : i32
    return %c0_i32, %arg0, %c0_i32_0 : i32, i32, i32
  }
  func.func @transform_1(%arg0: i32) -> (i32, i32) {
    %c0_i32 = arith.constant 0 : i32
    %c0_i32_0 = arith.constant 0 : i32
    %c0_i32_1 = arith.constant 0 : i32
    return %c0_i32, %c0_i32_0 : i32, i32
  }
  func.func @transform_2(%arg0: i32) -> (i32, i32) {
    %c0_i32 = arith.constant 0 : i32
    %c0_i32_0 = arith.constant 0 : i32
    %c0_i32_1 = arith.constant 0 : i32
    return %c0_i32, %c0_i32_0 : i32, i32
  }
  func.func @transform_3(%arg0: i32) -> (i32, i32, i32) {
    %c0_i32 = arith.constant 0 : i32
    %c0_i32_0 = arith.constant 0 : i32
    %c0_i32_1 = arith.constant 0 : i32
    return %arg0, %c0_i32, %c0_i32_0 : i32, i32, i32
  }
}

module attributes {stable_mosaic.version = 11 : i64} {
  func.func @matmul_bias_kernel(%arg0: i32, %arg1: memref<32x256xf32, #tpu.memory_space<vmem>>, %arg2: memref<256x128xf32, #tpu.memory_space<vmem>>, %arg3: memref<1x128xf32, #tpu.memory_space<vmem>>, %arg4: memref<32x128xf32, #tpu.memory_space<vmem>>) attributes {dimension_semantics = [#tpu.dimension_semantics<parallel>], iteration_bounds = array<i64: 1>, scalar_prefetch = 0 : i64, scratch_operands = 0 : i64, tpu.core_type = #tpu.core_type<tc>, window_params = [{transform_indices = @transform_0, window_bounds = array<i64: 32, 256>}, {pipeline_mode = #tpu.pipeline_mode<synchronous>, transform_indices = @transform_1, window_bounds = array<i64: 256, 128>}, {pipeline_mode = #tpu.pipeline_mode<synchronous>, transform_indices = @transform_2, window_bounds = array<i64: 1, 128>}, {transform_indices = @transform_3, window_bounds = array<i64: 32, 128>}]} {
    %c0 = arith.constant 0 : index
    %c0_0 = arith.constant 0 : index
    %0 = vector.load %arg1[%c0, %c0_0] : memref<32x256xf32, #tpu.memory_space<vmem>>, vector<32x256xf32>
    %c0_1 = arith.constant 0 : index
    %c0_2 = arith.constant 0 : index
    %1 = vector.load %arg2[%c0_1, %c0_2] : memref<256x128xf32, #tpu.memory_space<vmem>>, vector<256x128xf32>
    %cst = arith.constant dense<0.000000e+00> : vector<32x128xf32>
    %2 = tpu.matmul %0, %1, %cst {dimension_numbers = #tpu.dot_dimension_numbers<[1], [0], [0], [1], [0, 0, 1, 1], [], []>} : vector<32x256xf32>, vector<256x128xf32>, vector<32x128xf32> -> vector<32x128xf32>
    %c0_3 = arith.constant 0 : index
    %c0_4 = arith.constant 0 : index
    %3 = vector.load %arg3[%c0_3, %c0_4] : memref<1x128xf32, #tpu.memory_space<vmem>>, vector<1x128xf32>
    %4 = vector.broadcast %3 : vector<1x128xf32> to vector<32x128xf32>
    %5 = arith.addf %2, %4 : vector<32x128xf32>
    %c0_5 = arith.constant 0 : index
    %c0_6 = arith.constant 0 : index
    %6 = vector.load %arg4[%c0_5, %c0_6] : memref<32x128xf32, #tpu.memory_space<vmem>>, vector<32x128xf32>
    tpu.vector_store %arg4[%c0_5, %c0_6], %5 {strides = array<i32>} : memref<32x128xf32, #tpu.memory_space<vmem>>, vector<32x128xf32>,
    return
  }
  func.func @transform_0(%arg0: i32) -> (i32, i32) {
    %c0_i32 = arith.constant 0 : i32
    %c0_i32_0 = arith.constant 0 : i32
    return %arg0, %c0_i32 : i32, i32
  }
  func.func @transform_1(%arg0: i32) -> (i32, i32) {
    %c0_i32 = arith.constant 0 : i32
    %c0_i32_0 = arith.constant 0 : i32
    %c0_i32_1 = arith.constant 0 : i32
    return %c0_i32, %c0_i32_0 : i32, i32
  }
  func.func @transform_2(%arg0: i32) -> (i32, i32) {
    %c0_i32 = arith.constant 0 : i32
    %c0_i32_0 = arith.constant 0 : i32
    %c0_i32_1 = arith.constant 0 : i32
    return %c0_i32, %c0_i32_0 : i32, i32
  }
  func.func @transform_3(%arg0: i32) -> (i32, i32) {
    %c0_i32 = arith.constant 0 : i32
    %c0_i32_0 = arith.constant 0 : i32
    return %arg0, %c0_i32 : i32, i32
  }
}

module attributes {stable_mosaic.version = 11 : i64} {
  func.func @matmul_bias_kernel(%arg0: i32, %arg1: memref<32x128xf32, #tpu.memory_space<vmem>>, %arg2: memref<128x256xf32, #tpu.memory_space<vmem>>, %arg3: memref<1x256xf32, #tpu.memory_space<vmem>>, %arg4: memref<32x256xf32, #tpu.memory_space<vmem>>) attributes {dimension_semantics = [#tpu.dimension_semantics<parallel>], iteration_bounds = array<i64: 1>, scalar_prefetch = 0 : i64, scratch_operands = 0 : i64, tpu.core_type = #tpu.core_type<tc>, window_params = [{transform_indices = @transform_0, window_bounds = array<i64: 32, 128>}, {pipeline_mode = #tpu.pipeline_mode<synchronous>, transform_indices = @transform_1, window_bounds = array<i64: 128, 256>}, {pipeline_mode = #tpu.pipeline_mode<synchronous>, transform_indices = @transform_2, window_bounds = array<i64: 1, 256>}, {transform_indices = @transform_3, window_bounds = array<i64: 32, 256>}]} {
    %c0 = arith.constant 0 : index
    %c0_0 = arith.constant 0 : index
    %0 = vector.load %arg1[%c0, %c0_0] : memref<32x128xf32, #tpu.memory_space<vmem>>, vector<32x128xf32>
    %c0_1 = arith.constant 0 : index
    %c0_2 = arith.constant 0 : index
    %1 = vector.load %arg2[%c0_1, %c0_2] : memref<128x256xf32, #tpu.memory_space<vmem>>, vector<128x256xf32>
    %cst = arith.constant dense<0.000000e+00> : vector<32x256xf32>
    %2 = tpu.matmul %0, %1, %cst {dimension_numbers = #tpu.dot_dimension_numbers<[1], [0], [0], [1], [0, 0, 1, 1], [], []>} : vector<32x128xf32>, vector<128x256xf32>, vector<32x256xf32> -> vector<32x256xf32>
    %c0_3 = arith.constant 0 : index
    %c0_4 = arith.constant 0 : index
    %3 = vector.load %arg3[%c0_3, %c0_4] : memref<1x256xf32, #tpu.memory_space<vmem>>, vector<1x256xf32>
    %4 = vector.broadcast %3 : vector<1x256xf32> to vector<32x256xf32>
    %5 = arith.addf %2, %4 : vector<32x256xf32>
    %c0_5 = arith.constant 0 : index
    %c0_6 = arith.constant 0 : index
    %6 = vector.load %arg4[%c0_5, %c0_6] : memref<32x256xf32, #tpu.memory_space<vmem>>, vector<32x256xf32>
    tpu.vector_store %arg4[%c0_5, %c0_6], %5 {strides = array<i32>} : memref<32x256xf32, #tpu.memory_space<vmem>>, vector<32x256xf32>,
    return
  }
  func.func @transform_0(%arg0: i32) -> (i32, i32) {
    %c0_i32 = arith.constant 0 : i32
    %c0_i32_0 = arith.constant 0 : i32
    return %arg0, %c0_i32 : i32, i32
  }
  func.func @transform_1(%arg0: i32) -> (i32, i32) {
    %c0_i32 = arith.constant 0 : i32
    %c0_i32_0 = arith.constant 0 : i32
    %c0_i32_1 = arith.constant 0 : i32
    return %c0_i32, %c0_i32_0 : i32, i32
  }
  func.func @transform_2(%arg0: i32) -> (i32, i32) {
    %c0_i32 = arith.constant 0 : i32
    %c0_i32_0 = arith.constant 0 : i32
    %c0_i32_1 = arith.constant 0 : i32
    return %c0_i32, %c0_i32_0 : i32, i32
  }
  func.func @transform_3(%arg0: i32) -> (i32, i32) {
    %c0_i32 = arith.constant 0 : i32
    %c0_i32_0 = arith.constant 0 : i32
    return %arg0, %c0_i32 : i32, i32
  }
}

</mosaic_0001>

<bundles_post_ra>
// kernel: rnn_forward.3
= control target key start
LH: loop header
LB: loop body
LE: loop exit
PB: predicated region body
PF: predicated region fallthrough
CT: control target
= control target key end

     0   :  { %8 = vsyncpa [#allocation3], 0  ;;  %s358_s0 = inlined_call_operand.hbm [shape: f32[32,256], index: 0, kind: input, shape index: {}]   ;;  %s359_s1 = inlined_call_operand.hbm [shape: f32[256,128], index: 1, kind: input, shape index: {}]   ;;  %s360_s2 = inlined_call_operand.vmem [shape: f32[1,128], index: 2, kind: input, shape index: {}]   ;;  %s361_s3 = inlined_call_operand.vmem [shape: f32[32,128], index: 3, kind: output, shape index: {}]  }
   0x1   :  { %9 = vsyncpa [#allocation5], 0  ;;  %s311_s12 = smov [#allocation2]  }
   0x2   :  { %s15_s13 = sshll.u32 %s311_s12, 4  ;;  %s16_s13 = int_to_ptr.vmem [resolvable:$true] %s15_s13 }
   0x3   :  { %s275_s14 = scalar_lea.vmem %s16_s13, 1024  ;;  %p280_p1 = scmp.lt.s32.totalorder %s16_s13, %s16_s13 }
   0x4   :  { %p276_p0 = scmp.ne.s32.totalorder %s16_s13, %s275_s14  ;;  %p281_p2 = scmp.lt.s32.totalorder %s275_s14, %s275_s14 }
   0x6   :  { %p282_p3 = por %p281_p2, %p280_p1 }
   0x8   :  { %p283_p4 = pnand %p282_p3, %p276_p0 }
   0xa   :  { %286 = shalt.err (!%p283_p4)
}
   0xb   :  { %s312_s15 = smov 256   ;;  %s313_s16 = smov 16  }
   0xc   :  { %21 = dma.hbm_to_vmem [thread:$0]  %s358_s0, 1024, %s16_s13, [#allocation3], %s312_s15, %s312_s15, %s313_s16  }
   0xd   :  { %s314_s19 = smov [#allocation4]  }
   0xe   :  { %s27_s20 = sshll.u32 %s314_s19, 4  ;;  %s28_s20 = int_to_ptr.vmem [resolvable:$true] %s27_s20 }
   0xf   :  { %s295_s21 = scalar_lea.vmem %s28_s20, 4096  ;;  %p300_p6 = scmp.lt.s32.totalorder %s28_s20, %s28_s20 }
  0x10   :  { %p296_p5 = scmp.ne.s32.totalorder %s28_s20, %s295_s21  ;;  %p301_p7 = scmp.lt.s32.totalorder %s295_s21, %s295_s21 }
  0x12   :  { %p302_p8 = por %p301_p7, %p300_p6 }
  0x14   :  { %p303_p9 = pnand %p302_p8, %p296_p5 }
  0x16   :  { %306 = shalt.err (!%p303_p9)
}
  0x17   :  { %s315_s22 = smov 128   ;;  %s316_s23 = smov 8  }
  0x18   :  { %33 = dma.hbm_to_vmem [thread:$0]  %s359_s1, 4096, %s28_s20, [#allocation5], %s315_s22, %s315_s22, %s316_s23  }
  0x19   :  { %307 = dma.done.wait [#allocation3], 1024  }
  0x1a   :  { %308 = vsyncadd [#allocation3], 4294966272 }
  0x1b   :  { %309 = dma.done.wait [#allocation5], 4096  }
  0x1c   :  { %310 = vsyncadd [#allocation5], 4294963200  ;;  %v81_v0 = vld [vmem:[#allocation4 + $0xf8] sm:$0xff]  ;;  %v80_v2 = vld [vmem:[#allocation4 + $0xf0] sm:$0xff] }
  0x1d   :  { %v65_v1 = vld [vmem:[#allocation4 + $0x78] sm:$0xff]  ;;  %185 = vmatprep.subr.mxu0 %v81_v0  ;;  %229 = vmatprep.subr.mxu1 %v81_v0  ;;  %v64_v3 = vld [vmem:[#allocation4 + $0x70] sm:$0xff]  ;;  %v79_v4 = vld [vmem:[#allocation4 + $0xe8] sm:$0xff] }
  0x1e   :  { %186 = vmatpush3.msra.mxu0 %v65_v1  ;;  %245 = vmatpush3.msra.mxu1 %v65_v1  ;;  %v63_v5 = vld [vmem:[#allocation4 + $0x68] sm:$0xff]  ;;  %v78_v6 = vld [vmem:[#allocation4 + $0xe0] sm:$0xff]  ;;  %v77_v8 = vld [vmem:[#allocation4 + $0xd8] sm:$0xff] }
  0x1f   :  { %187 = vmatprep.subr.mxu0 %v80_v2  ;;  %230 = vmatprep.subr.mxu1 %v80_v2  ;;  %v62_v7 = vld [vmem:[#allocation4 + $0x60] sm:$0xff]  ;;  %v61_v9 = vld [vmem:[#allocation4 + $0x58] sm:$0xff]  ;;  %v76_v10 = vld [vmem:[#allocation4 + $0xd0] sm:$0xff] }
  0x20   :  { %188 = vmatpush3.msra.mxu0 %v64_v3  ;;  %246 = vmatpush3.msra.mxu1 %v64_v3  ;;  %v60_v11 = vld [vmem:[#allocation4 + $0x50] sm:$0xff]  ;;  %v75_v12 = vld [vmem:[#allocation4 + $0xc8] sm:$0xff]  ;;  %v74_v14 = vld [vmem:[#allocation4 + $0xc0] sm:$0xff] }
  0x21   :  { %189 = vmatprep.subr.mxu0 %v79_v4  ;;  %231 = vmatprep.subr.mxu1 %v79_v4  ;;  %v59_v13 = vld [vmem:[#allocation4 + $0x48] sm:$0xff]  ;;  %v58_v15 = vld [vmem:[#allocation4 + $0x40] sm:$0xff]  ;;  %v73_v16 = vld [vmem:[#allocation4 + $0xb8] sm:$0xff] }
  0x22   :  { %190 = vmatpush3.msra.mxu0 %v63_v5  ;;  %247 = vmatpush3.msra.mxu1 %v63_v5  ;;  %v57_v17 = vld [vmem:[#allocation4 + $0x38] sm:$0xff]  ;;  %v72_v18 = vld [vmem:[#allocation4 + $0xb0] sm:$0xff]  ;;  %v71_v20 = vld [vmem:[#allocation4 + $0xa8] sm:$0xff] }
  0x23   :  { %191 = vmatprep.subr.mxu0 %v78_v6  ;;  %232 = vmatprep.subr.mxu1 %v78_v6  ;;  %v56_v19 = vld [vmem:[#allocation4 + $0x30] sm:$0xff]  ;;  %v55_v21 = vld [vmem:[#allocation4 + $0x28] sm:$0xff]  ;;  %v70_v22 = vld [vmem:[#allocation4 + $0xa0] sm:$0xff] }
  0x24   :  { %192 = vmatpush3.msra.mxu0 %v62_v7  ;;  %248 = vmatpush3.msra.mxu1 %v62_v7  ;;  %v54_v23 = vld [vmem:[#allocation4 + $0x20] sm:$0xff]  ;;  %v69_v24 = vld [vmem:[#allocation4 + $0x98] sm:$0xff]  ;;  %v68_v26 = vld [vmem:[#allocation4 + $0x90] sm:$0xff] }
  0x25   :  { %193 = vmatprep.subr.mxu0 %v77_v8  ;;  %233 = vmatprep.subr.mxu1 %v77_v8  ;;  %v53_v25 = vld [vmem:[#allocation4 + $0x18] sm:$0xff]  ;;  %v52_v27 = vld [vmem:[#allocation4 + $0x10] sm:$0xff]  ;;  %v67_v28 = vld [vmem:[#allocation4 + $0x88] sm:$0xff] }
  0x26   :  { %194 = vmatpush3.msra.mxu0 %v61_v9  ;;  %249 = vmatpush3.msra.mxu1 %v61_v9  ;;  %v51_v29 = vld [vmem:[#allocation4 + $0x8] sm:$0xff]  ;;  %v66_v30 = vld [vmem:[#allocation4 + $0x80] sm:$0xff]  ;;  %v45_v36 = vld [vmem:[#allocation2 + $0x18] sm:$0xff] }
  0x27   :  { %195 = vmatprep.subr.mxu0 %v76_v10  ;;  %234 = vmatprep.subr.mxu1 %v76_v10  ;;  %v50_v31 = vld [vmem:[#allocation4] sm:$0xff]  ;;  %v43_v32 = vld [vmem:[#allocation2 + $0x8] sm:$0xff]  ;;  %v49_v37 = vld [vmem:[#allocation2 + $0x38] sm:$0xff] }
  0x28   :  { %196 = vmatpush3.msra.mxu0 %v60_v11  ;;  %250 = vmatpush3.msra.mxu1 %v60_v11  ;;  %v47_v33 = vld [vmem:[#allocation2 + $0x28] sm:$0xff]  ;;  %v42_v34 = vld [vmem:[#allocation2] sm:$0xff]  ;;  %v44_v38 = vld [vmem:[#allocation2 + $0x10] sm:$0xff] }
  0x29   :  { %197 = vmatprep.subr.mxu0 %v75_v12  ;;  %235 = vmatprep.subr.mxu1 %v75_v12  ;;  %v46_v35 = vld [vmem:[#allocation2 + $0x20] sm:$0xff]  ;;  %v48_v39 = vld [vmem:[#allocation2 + $0x30] sm:$0xff] }
  0x2a   :  { %198 = vmatpush3.msra.mxu0 %v59_v13  ;;  %251 = vmatpush3.msra.mxu1 %v59_v13  ;;  %v184_v42 = vld [vmem:[%s360_s2] ss:$0 sm:$0xff] }
  0x2b   :  { %199 = vmatprep.subr.mxu0 %v74_v14  ;;  %236 = vmatprep.subr.mxu1 %v74_v14 }
  0x2c   :  { %200 = vmatpush3.msra.mxu0 %v58_v15  ;;  %252 = vmatpush3.msra.mxu1 %v58_v15 }
  0x2d   :  { %201 = vmatprep.subr.mxu0 %v73_v16  ;;  %237 = vmatprep.subr.mxu1 %v73_v16 }
  0x2e   :  { %202 = vmatpush3.msra.mxu0 %v57_v17  ;;  %253 = vmatpush3.msra.mxu1 %v57_v17 }
  0x2f   :  { %203 = vmatprep.subr.mxu0 %v72_v18  ;;  %238 = vmatprep.subr.mxu1 %v72_v18 }
  0x30   :  { %204 = vmatpush3.msra.mxu0 %v56_v19  ;;  %254 = vmatpush3.msra.mxu1 %v56_v19 }
  0x31   :  { %205 = vmatprep.subr.mxu0 %v71_v20  ;;  %239 = vmatprep.subr.mxu1 %v71_v20 }
  0x32   :  { %206 = vmatpush3.msra.mxu0 %v55_v21  ;;  %255 = vmatpush3.msra.mxu1 %v55_v21 }
  0x33   :  { %207 = vmatprep.subr.mxu0 %v70_v22  ;;  %240 = vmatprep.subr.mxu1 %v70_v22 }
  0x34   :  { %208 = vmatpush3.msra.mxu0 %v54_v23  ;;  %256 = vmatpush3.msra.mxu1 %v54_v23 }
  0x35   :  { %209 = vmatprep.subr.mxu0 %v69_v24  ;;  %241 = vmatprep.subr.mxu1 %v69_v24 }
  0x36   :  { %210 = vmatpush3.msra.mxu0 %v53_v25  ;;  %257 = vmatpush3.msra.mxu1 %v53_v25 }
  0x37   :  { %211 = vmatprep.subr.mxu0 %v68_v26  ;;  %242 = vmatprep.subr.mxu1 %v68_v26 }
  0x38   :  { %212 = vmatpush3.msra.mxu0 %v52_v27  ;;  %258 = vmatpush3.msra.mxu1 %v52_v27 }
  0x39   :  { %213 = vmatprep.subr.mxu0 %v67_v28  ;;  %243 = vmatprep.subr.mxu1 %v67_v28 }
  0x3a   :  { %214 = vmatpush3.msra.mxu0 %v51_v29  ;;  %259 = vmatpush3.msra.mxu1 %v51_v29 }
  0x3b   :  { %215 = vmatprep.subr.mxu0 %v66_v30  ;;  %244 = vmatprep.subr.mxu1 %v66_v30 }
  0x3c   :  { %216 = vmatpush3.msra.mxu0 %v50_v31  ;;  %260 = vmatpush3.msra.mxu1 %v50_v31 }
  0x3d   :  { %153 = vmatprep.mubr.f32.mxu0 %v43_v32  ;;  %163 = vmatprep.mubr.f32.mxu1 %v47_v33 }
  0x3e   :  { %154 = vmatmul.mubr.f32.vlgmr.msra.gmra.mxu0 %v42_v34  ;;  %164 = vmatmul.mubr.f32.vlgmr.msra.gmra.mxu1 %v46_v35 }
  0x3f   :  { %158 = vmatprep.mubr.f32.mxu0 %v45_v36  ;;  %168 = vmatprep.mubr.f32.mxu1 %v49_v37 }
  0x42   :  { %159 = vmatmul.mubr.f32.gmra.mxu0 %v44_v38  ;;  %169 = vmatmul.mubr.f32.gmra.mxu1 %v48_v39 }
  0xfe   :  { %v217_v40 = vpop.f32.mrf.mxu0  ;;  %v223_v41 = vpop.f32.mrf.mxu1 }
 0x100   :  { %v218_v43 = vpop.f32.mrf.mxu0  ;;  %v224_v44 = vpop.f32.mrf.mxu1 }
 0x101   :  { %v219_v45 = vadd.f32 %v218_v43, %v217_v40  ;;  %v225_v46 = vadd.f32 %v224_v44, %v223_v41 }
 0x102   :  { %v220_v47 = vpop.f32.mrf.mxu0  ;;  %v226_v48 = vpop.f32.mrf.mxu1 }
 0x103   :  { %v156_v49 = vadd.f32 %v219_v45, %v184_v42  ;;  %v166_v50 = vadd.f32 %v225_v46, %v184_v42 }
 0x104   :  { %v221_v51 = vpop.f32.mrf.mxu0  ;;  %v227_v52 = vpop.f32.mrf.mxu1 }
 0x105   :  { %174 = vst [vmem:[%s361_s3] sm:$0xff] %v156_v49  ;;  %176 = vst [vmem:[%s361_s3 + $0x10] sm:$0xff] %v166_v50  ;;  %v222_v53 = vadd.f32 %v221_v51, %v220_v47  ;;  %v228_v54 = vadd.f32 %v227_v52, %v226_v48 }
 0x107   :  { %v161_v55 = vadd.f32 %v222_v53, %v184_v42  ;;  %v171_v56 = vadd.f32 %v228_v54, %v184_v42 }
 0x109   :  { %175 = vst [vmem:[%s361_s3 + $0x8] sm:$0xff] %v161_v55  ;;  %177 = vst [vmem:[%s361_s3 + $0x18] sm:$0xff] %v171_v56 }
 0x10a   :  { %182 = vsyncpa [#allocation3], 1 }
 0x10b   :  { %183 = vsyncpa [#allocation5], 1 }

// kernel: rnn_forward.4
= control target key start
LH: loop header
LB: loop body
LE: loop exit
PB: predicated region body
PF: predicated region fallthrough
CT: control target
= control target key end

     0   :  { %s1557_s12 = smov 0   ;;  %s1559_s13 = smov 0   ;;  %s2011_s0 = inlined_call_operand.vmem [shape: f32[2,16,128], index: 0, kind: input, shape index: {}]   ;;  %s2012_s1 = inlined_call_operand.vmem [shape: f32[2,128], index: 1, kind: input, shape index: {}]   ;;  %s2013_s2 = inlined_call_operand.vmem [shape: f32[128,128], index: 2, kind: input, shape index: {}]   ;;  %s2014_s3 = inlined_call_operand.vmem [shape: f32[16,2,128], index: 3, kind: output, shape index: {}]  }
   0x1   :  { %s1561_s14 = smov 0  }
   0x2 LB: > { %s1016_s15 = sadd.s32 4294967295, %s1533_s14   ;;  %s1574_s16 = sadd.s32 1, %s1533_s14   ;;  %s1533_s14 = sphi %s1561_s14, %s2017_s14   ;;  %s1529_s13 = sphi %s1559_s13, %s2016_s13   ;;  %s1525_s12 = sphi %s1557_s12, %s2015_s12  }
   0x3   : > { %s17_s17 = ssub.s32 %s1533_s14, %s1574_s16  ;;  %s20_s18 = sadd.s32 1, %s1529_s13 }
   0x4   : > { %p18_p0 = scmp.eq.s32.totalorder %s17_s17, 0  ;;  %p27_p1 = scmp.ne.s32.totalorder %s1529_s13, %s1525_s12 }
   0x5   : > { %p28_p2 = scmp.eq.s32.totalorder %s1533_s14, 0  ;;  %p1019_p4 = scmp.ge.s32.totalorder %s1533_s14, 2 }
   0x6   : > { %s1583_s19 = scalar_select %p18_p0, %s1529_s13, %s20_s18  }
   0x7   : > { %p29_p3 = por %p28_p2, %p27_p1  ;;  %127 = sbr.rel (%p1019_p4) target bundleno = 17 (0x11), region = 24 }
   0xc   : > { %130 = sbr.rel (!%p29_p3) target bundleno = 17 (0x11), region = 28  ;;  %s132_s20 = sand.u32 (%p29_p3), 1, %s1529_s13  }
   0xd   : > { %s1021_s21 = sshll.u32 (%p29_p3), %s1533_s14, 3  ;;  %s1020_s22 = sshll.u32 (%p29_p3), %s132_s20, 4 }
   0xe   : > { %s136_s25 = scalar_lea.vmem (%p29_p3), %s2011_s0, %s1021_s21  ;;  %s134_s26 = scalar_lea.vmem (%p29_p3), [#allocation3], %s1020_s22 }
   0xf   : > { %v167_v0 = vld [vmem:[%s136_s25] sm:$0xff] (%p29_p3)  ;;  %v169_v1 = vld [vmem:[%s136_s25 + $0x10] sm:$0xff] (%p29_p3) }
  0x10   : > { %168 = vst [vmem:[%s134_s26] sm:$0xff] (%p29_p3), %v167_v0  ;;  %170 = vst [vmem:[%s134_s26 + $0x8] sm:$0xff] (%p29_p3), %v169_v1 }
  0x11 PF: > { %p1022_p5 = scmp.ge.s32.totalorder %s1533_s14, 1  ;;  %p175_p6 = scmp.lt.s32.totalorder %s1533_s14, 3 }
  0x13   : > { %p176_p7 = pnand %p1022_p5, %p175_p6 }
  0x14   : > { %s182_s27 = sand.u32 (!%p176_p7), 1, %s1525_s12   ;;  %s1024_s28 = sshll.u32 (!%p176_p7), %s1016_s15, 3 }
  0x15   : > { %179 = sbr.rel (%p176_p7) target bundleno = 1784 (0x6f8), region = 66  ;;  %s1596_s29 = sshll.u32 (!%p176_p7), %s182_s27, 4 }
  0x16   : > { %p206_p8 = scmp.lt.s32.totalorder (!%p176_p7), %s1024_s28, 15  ;;  %s184_s7 = scalar_lea.vmem (!%p176_p7), [#allocation3], %s1596_s29 }
  0x17   : > { %p1026_p9 = scmp.ne.s32.totalorder (!%p176_p7), %s1016_s15, 0 }
  0x1a   : > { %s2019_s28 = smov (!%p206_p8, %s1024_s28), 15  ;;  %214 = sbr.rel (%p1026_p9) target bundleno = 33 (0x21), region = 74 }
  0x1b   : > { %s1025_s30 = sshll.u32 %s2019_s28, 1 }
  0x1c   : > { %s1601_s6 = scalar_lea.vmem %s2014_s3, %s1025_s30 }
  0x1f   : > { %v215_v2 = vld [vmem:[%s2012_s1] sm:$0x3] }
  0x20   : > { %216 = vst [vmem:[#allocation2] sm:$0x3] %v215_v2 }
  0x21 PF: > { %v1612_v3 = vld [vmem:[%s2013_s2 + $0x78] sm:$0xff]  ;;  %v1535_v4 = vmov 0.0   ;;  %v1618_v5 = vld [vmem:[%s2013_s2 + $0x70] sm:$0xff]  ;;  %vm1536_vm0 = vmmov 0   ;;  %v1628_v6 = vld [vmem:[%s2013_s2 + $0x68] sm:$0xff]  ;;  %vm317_vm1 = vcmask 1041409  }
  0x22   : > { %1173 = vmatprep.subr.mxu0 %v1535_v4  ;;  %1205 = vmatprep.mubr.msk.f32.mxu0 %vm1536_vm0, %v1535_v4  ;;  %v1637_v7 = vld [vmem:[%s2013_s2 + $0x60] sm:$0xff]  ;;  %v1646_v8 = vld [vmem:[%s2013_s2 + $0x58] sm:$0xff]  ;;  %v1655_v9 = vld [vmem:[%s2013_s2 + $0x50] sm:$0xff]  ;;  %vm402_vm2 = vcmask 1042434   ;;  %vm492_vm3 = vcmask 1043459   ;;  %vm583_vm4 = vcmask 1044484  }
  0x23   : > { %1174 = vmatpush3.msra.mxu0 %v1612_v3  ;;  %1208 = vmatprep.subr.mxu1 %v1535_v4  ;;  %v1664_v10 = vld [vmem:[%s2013_s2 + $0x48] sm:$0xff]  ;;  %v1673_v11 = vld [vmem:[%s2013_s2 + $0x40] sm:$0xff]  ;;  %v1682_v12 = vld [vmem:[%s2013_s2 + $0x38] sm:$0xff]  ;;  %vm674_vm5 = vcmask 1045509   ;;  %vm765_vm6 = vcmask 1046534   ;;  %vm856_vm7 = vcmask 1047559  }
  0x24   : > { %1175 = vmatprep.subr.mxu0 %v1535_v4  ;;  %1209 = vmatpush3.msra.mxu1 %v1612_v3  ;;  %v1691_v13 = vld [vmem:[%s2013_s2 + $0x30] sm:$0xff]  ;;  %v1700_v14 = vld [vmem:[%s2013_s2 + $0x28] sm:$0xff]  ;;  %v1709_v15 = vld [vmem:[%s2013_s2 + $0x20] sm:$0xff] }
  0x25   : > { %1176 = vmatpush3.msra.mxu0 %v1618_v5  ;;  %1210 = vmatprep.subr.mxu1 %v1535_v4  ;;  %v1718_v16 = vld [vmem:[%s2013_s2 + $0x18] sm:$0xff]  ;;  %v1727_v17 = vld [vmem:[%s2013_s2 + $0x10] sm:$0xff]  ;;  %v1736_v18 = vld [vmem:[%s2013_s2 + $0x8] sm:$0xff] }
  0x26   : > { %1177 = vmatprep.subr.mxu0 %v1535_v4  ;;  %1211 = vmatpush3.msra.mxu1 %v1618_v5  ;;  %v1745_v19 = vld [vmem:[%s2013_s2] sm:$0xff] }
  0x27   : > { %1178 = vmatpush3.msra.mxu0 %v1628_v6  ;;  %1212 = vmatprep.subr.mxu1 %v1535_v4  ;;  %v217_v20 = vld [vmem:[#allocation2] sm:$0x3]  ;;  %v1795_v21 = vld [vmem:[%s184_s7] sm:$0xff] }
  0x28   : > { %1179 = vmatprep.subr.mxu0 %v1535_v4  ;;  %1213 = vmatpush3.msra.mxu1 %v1628_v6  ;;  %v1799_v22 = vld [vmem:[%s184_s7 + $0x8] sm:$0xff] }
  0x29   : > { %1180 = vmatpush3.msra.mxu0 %v1637_v7  ;;  %1214 = vmatprep.subr.mxu1 %v1535_v4 }
  0x2a   : > { %1181 = vmatprep.subr.mxu0 %v1535_v4  ;;  %1215 = vmatpush3.msra.mxu1 %v1637_v7 }
  0x2b   : > { %1182 = vmatpush3.msra.mxu0 %v1646_v8  ;;  %1216 = vmatprep.subr.mxu1 %v1535_v4 }
  0x2c   : > { %1183 = vmatprep.subr.mxu0 %v1535_v4  ;;  %1217 = vmatpush3.msra.mxu1 %v1646_v8 }
  0x2d   : > { %1184 = vmatpush3.msra.mxu0 %v1655_v9  ;;  %1218 = vmatprep.subr.mxu1 %v1535_v4 }
  0x2e   : > { %1185 = vmatprep.subr.mxu0 %v1535_v4  ;;  %1219 = vmatpush3.msra.mxu1 %v1655_v9 }
  0x2f   : > { %1186 = vmatpush3.msra.mxu0 %v1664_v10  ;;  %1220 = vmatprep.subr.mxu1 %v1535_v4 }
  0x30   : > { %1187 = vmatprep.subr.mxu0 %v1535_v4  ;;  %1221 = vmatpush3.msra.mxu1 %v1664_v10 }
  0x31   : > { %1188 = vmatpush3.msra.mxu0 %v1673_v11  ;;  %1222 = vmatprep.subr.mxu1 %v1535_v4 }
  0x32   : > { %1189 = vmatprep.subr.mxu0 %v1535_v4  ;;  %1223 = vmatpush3.msra.mxu1 %v1673_v11 }
  0x33   : > { %1190 = vmatpush3.msra.mxu0 %v1682_v12  ;;  %1224 = vmatprep.subr.mxu1 %v1535_v4 }
  0x34   : > { %1191 = vmatprep.subr.mxu0 %v1535_v4  ;;  %1225 = vmatpush3.msra.mxu1 %v1682_v12 }
  0x35   : > { %1192 = vmatpush3.msra.mxu0 %v1691_v13  ;;  %1226 = vmatprep.subr.mxu1 %v1535_v4 }
  0x36   : > { %1193 = vmatprep.subr.mxu0 %v1535_v4  ;;  %1227 = vmatpush3.msra.mxu1 %v1691_v13 }
  0x37   : > { %1194 = vmatpush3.msra.mxu0 %v1700_v14  ;;  %1228 = vmatprep.subr.mxu1 %v1535_v4 }
  0x38   : > { %1195 = vmatprep.subr.mxu0 %v1535_v4  ;;  %1229 = vmatpush3.msra.mxu1 %v1700_v14 }
  0x39   : > { %1196 = vmatpush3.msra.mxu0 %v1709_v15  ;;  %1230 = vmatprep.subr.mxu1 %v1535_v4 }
  0x3a   : > { %1197 = vmatprep.subr.mxu0 %v1535_v4  ;;  %1231 = vmatpush3.msra.mxu1 %v1709_v15 }
  0x3b   : > { %1198 = vmatpush3.msra.mxu0 %v1718_v16  ;;  %1232 = vmatprep.subr.mxu1 %v1535_v4 }
  0x3c   : > { %1199 = vmatprep.subr.mxu0 %v1535_v4  ;;  %1233 = vmatpush3.msra.mxu1 %v1718_v16 }
  0x3d   : > { %1200 = vmatpush3.msra.mxu0 %v1727_v17  ;;  %1234 = vmatprep.subr.mxu1 %v1535_v4 }
  0x3e   : > { %1201 = vmatprep.subr.mxu0 %v1535_v4  ;;  %1235 = vmatpush3.msra.mxu1 %v1727_v17 }
  0x3f   : > { %1202 = vmatpush3.msra.mxu0 %v1736_v18  ;;  %1236 = vmatprep.subr.mxu1 %v1535_v4 }
  0x40   : > { %1203 = vmatprep.subr.mxu0 %v1535_v4  ;;  %1237 = vmatpush3.msra.mxu1 %v1736_v18 }
  0x41   : > { %1204 = vmatpush3.msra.mxu0 %v1745_v19  ;;  %1238 = vmatprep.subr.mxu1 %v1535_v4 }
  0x42   : > { %1206 = vmatmul.mubr.f32.vlgmr.msra.gmra.mxu0 %v217_v20  ;;  %1239 = vmatpush3.msra.mxu1 %v1745_v19 }
  0x43   : > { %1240 = vmatprep.mubr.msk.f32.mxu1 %vm1536_vm0, %v1535_v4  ;;  %1243 = vmatprep.subr.mxu0 %v1535_v4 }
  0x44   : > { %1244 = vmatpush3.msra.mxu0 %v1612_v3  ;;  %1275 = vmatprep.mubr.msk.f32.mxu0 %vm1536_vm0, %v1535_v4 }
  0x45   : > { %1245 = vmatprep.subr.mxu0 %v1535_v4  ;;  %1278 = vmatprep.subr.mxu1 %v1535_v4 }
  0x46   : > { %1246 = vmatpush3.msra.mxu0 %v1618_v5 }
  0x47   : > { %1247 = vmatprep.subr.mxu0 %v1535_v4 }
  0x48   : > { %1248 = vmatpush3.msra.mxu0 %v1628_v6 }
  0x49   : > { %1249 = vmatprep.subr.mxu0 %v1535_v4 }
  0x4a   : > { %1250 = vmatpush3.msra.mxu0 %v1637_v7 }
  0x4b   : > { %1251 = vmatprep.subr.mxu0 %v1535_v4 }
  0x4c   : > { %1252 = vmatpush3.msra.mxu0 %v1646_v8 }
  0x4d   : > { %1253 = vmatprep.subr.mxu0 %v1535_v4 }
  0x4e   : > { %1254 = vmatpush3.msra.mxu0 %v1655_v9 }
  0x4f   : > { %1255 = vmatprep.subr.mxu0 %v1535_v4 }
  0x50   : > { %1256 = vmatpush3.msra.mxu0 %v1664_v10 }
  0x51   : > { %1257 = vmatprep.subr.mxu0 %v1535_v4 }
  0x52   : > { %1258 = vmatpush3.msra.mxu0 %v1673_v11 }
  0x53   : > { %1259 = vmatprep.subr.mxu0 %v1535_v4 }
  0x54   : > { %1260 = vmatpush3.msra.mxu0 %v1682_v12 }
  0x55   : > { %1261 = vmatprep.subr.mxu0 %v1535_v4 }
  0x56   : > { %1262 = vmatpush3.msra.mxu0 %v1691_v13 }
  0x57   : > { %1263 = vmatprep.subr.mxu0 %v1535_v4 }
  0x58   : > { %1264 = vmatpush3.msra.mxu0 %v1700_v14 }
  0x59   : > { %1265 = vmatprep.subr.mxu0 %v1535_v4 }
  0x5a   : > { %1266 = vmatpush3.msra.mxu0 %v1709_v15 }
  0x5b   : > { %1267 = vmatprep.subr.mxu0 %v1535_v4 }
  0x5c   : > { %1268 = vmatpush3.msra.mxu0 %v1718_v16 }
  0x5d   : > { %1269 = vmatprep.subr.mxu0 %v1535_v4 }
  0x5e   : > { %1270 = vmatpush3.msra.mxu0 %v1727_v17 }
  0x5f   : > { %1271 = vmatprep.subr.mxu0 %v1535_v4 }
  0x60   : > { %1272 = vmatpush3.msra.mxu0 %v1736_v18 }
  0x61   : > { %1273 = vmatprep.subr.mxu0 %v1535_v4 }
  0x62   : > { %1274 = vmatpush3.msra.mxu0 %v1745_v19 }
  0x63   : > { %1313 = vmatprep.subr.mxu0 %v1535_v4 }
 0x102   : > { %v302_v23 = vpop.f32.mrf.mxu0 }
 0x103   : > { %v307_v24 = vrot.slane %v302_v23, 1  ;;  %v310_v26 = vadd.f32 %v302_v23, %v1795_v21 }
 0x104   : > { %v1207_v25 = vpop.f32.mrf.mxu0 }
 0x105   : > { %v311_v27 = vadd.f32 %v307_v24, %v1799_v22 }
 0x107   : > { %1479 = vtanh.f32 %v311_v27 }
 0x108   : > { %1481 = vtanh.f32 %v310_v26 }
 0x114   : > { %v1480_v28 = vpop.eup %1479 }
 0x115   : > { %v316_v29 = vrot.slane %v1480_v28, 7  ;;  %v1482_v30 = vpop.eup %1481 }
 0x117   : > { %v318_v31 = vsel %vm317_vm1, %v316_v29, %v1482_v30 }
 0x118   : > { %320 = vst [vmem:[%s1601_s6] sm:$0x3] %v318_v31  ;;  %1241 = vmatmul.mubr.f32.vlgmr.msra.gmra.mxu1 %v318_v31 }
 0x119   : > { %1279 = vmatpush3.msra.mxu1 %v1612_v3  ;;  %1310 = vmatprep.mubr.msk.f32.mxu1 %vm1536_vm0, %v1535_v4 }
 0x11a   : > { %1280 = vmatprep.subr.mxu1 %v1535_v4 }
 0x11b   : > { %1281 = vmatpush3.msra.mxu1 %v1618_v5 }
 0x11c   : > { %1282 = vmatprep.subr.mxu1 %v1535_v4 }
 0x11d   : > { %1283 = vmatpush3.msra.mxu1 %v1628_v6 }
 0x11e   : > { %1284 = vmatprep.subr.mxu1 %v1535_v4 }
 0x11f   : > { %1285 = vmatpush3.msra.mxu1 %v1637_v7 }
 0x120   : > { %1286 = vmatprep.subr.mxu1 %v1535_v4 }
 0x121   : > { %1287 = vmatpush3.msra.mxu1 %v1646_v8 }
 0x122   : > { %1288 = vmatprep.subr.mxu1 %v1535_v4 }
 0x123   : > { %1289 = vmatpush3.msra.mxu1 %v1655_v9 }
 0x124   : > { %1290 = vmatprep.subr.mxu1 %v1535_v4 }
 0x125   : > { %1291 = vmatpush3.msra.mxu1 %v1664_v10 }
 0x126   : > { %1292 = vmatprep.subr.mxu1 %v1535_v4 }
 0x127   : > { %1293 = vmatpush3.msra.mxu1 %v1673_v11 }
 0x128   : > { %1294 = vmatprep.subr.mxu1 %v1535_v4 }
 0x129   : > { %1295 = vmatpush3.msra.mxu1 %v1682_v12 }
 0x12a   : > { %1296 = vmatprep.subr.mxu1 %v1535_v4 }
 0x12b   : > { %1297 = vmatpush3.msra.mxu1 %v1691_v13 }
 0x12c   : > { %1298 = vmatprep.subr.mxu1 %v1535_v4 }
 0x12d   : > { %1299 = vmatpush3.msra.mxu1 %v1700_v14 }
 0x12e   : > { %1300 = vmatprep.subr.mxu1 %v1535_v4 }
 0x12f   : > { %1301 = vmatpush3.msra.mxu1 %v1709_v15 }
 0x130   : > { %1302 = vmatprep.subr.mxu1 %v1535_v4 }
 0x131   : > { %1303 = vmatpush3.msra.mxu1 %v1718_v16 }
 0x132   : > { %1304 = vmatprep.subr.mxu1 %v1535_v4 }
 0x133   : > { %1305 = vmatpush3.msra.mxu1 %v1727_v17 }
 0x134   : > { %1306 = vmatprep.subr.mxu1 %v1535_v4 }
 0x135   : > { %1307 = vmatpush3.msra.mxu1 %v1736_v18 }
 0x136   : > { %1308 = vmatprep.subr.mxu1 %v1535_v4 }
 0x137   : > { %1309 = vmatpush3.msra.mxu1 %v1745_v19 }
 0x138   : > { %1348 = vmatprep.subr.mxu1 %v1535_v4 }
 0x1d8   : > { %v387_v32 = vpop.f32.mrf.mxu1 }
 0x1d9   : > { %v392_v33 = vrot.slane %v387_v32, 7  ;;  %v396_v34 = vadd.f32 %v387_v32, %v1799_v22 }
 0x1da   : > { %v1242_v35 = vpop.f32.mrf.mxu1 }
 0x1db   : > { %v395_v36 = vadd.f32 %v392_v33, %v1795_v21  ;;  %1483 = vtanh.f32 %v396_v34 }
 0x1dd   : > { %1485 = vtanh.f32 %v395_v36 }
 0x1e8   : > { %v1484_v37 = vpop.eup %1483 }
 0x1e9   : > { %v401_v38 = vrot.slane %v1484_v37, 7 }
 0x1ea   : > { %v1486_v39 = vpop.eup %1485 }
 0x1eb   : > { %v403_v40 = vsel %vm402_vm2, %v401_v38, %v1486_v39  ;;  %v407_v41 = vrot.slane %v1486_v39, 1 }
 0x1ec   : > { %1027 = vst [vmem:[%s1601_s6 + $0x1] sm:$0x6] %v403_v40 }
 0x1ed   : > { %v408_v42 = vsel %vm317_vm1, %v1484_v37, %v407_v41 }
 0x1ee   : > { %1276 = vmatmul.mubr.f32.vlgmr.msra.gmra.mxu0 %v408_v42 }
 0x1ef   : > { %1314 = vmatpush3.msra.mxu0 %v1612_v3  ;;  %1345 = vmatprep.mubr.msk.f32.mxu0 %vm1536_vm0, %v1535_v4 }
 0x1f0   : > { %1315 = vmatprep.subr.mxu0 %v1535_v4 }
 0x1f1   : > { %1316 = vmatpush3.msra.mxu0 %v1618_v5 }
 0x1f2   : > { %1317 = vmatprep.subr.mxu0 %v1535_v4 }
 0x1f3   : > { %1318 = vmatpush3.msra.mxu0 %v1628_v6 }
 0x1f4   : > { %1319 = vmatprep.subr.mxu0 %v1535_v4 }
 0x1f5   : > { %1320 = vmatpush3.msra.mxu0 %v1637_v7 }
 0x1f6   : > { %1321 = vmatprep.subr.mxu0 %v1535_v4 }
 0x1f7   : > { %1322 = vmatpush3.msra.mxu0 %v1646_v8 }
 0x1f8   : > { %1323 = vmatprep.subr.mxu0 %v1535_v4 }
 0x1f9   : > { %1324 = vmatpush3.msra.mxu0 %v1655_v9 }
 0x1fa   : > { %1325 = vmatprep.subr.mxu0 %v1535_v4 }
 0x1fb   : > { %1326 = vmatpush3.msra.mxu0 %v1664_v10 }
 0x1fc   : > { %1327 = vmatprep.subr.mxu0 %v1535_v4 }
 0x1fd   : > { %1328 = vmatpush3.msra.mxu0 %v1673_v11 }
 0x1fe   : > { %1329 = vmatprep.subr.mxu0 %v1535_v4 }
 0x1ff   : > { %1330 = vmatpush3.msra.mxu0 %v1682_v12 }
 0x200   : > { %1331 = vmatprep.subr.mxu0 %v1535_v4 }
 0x201   : > { %1332 = vmatpush3.msra.mxu0 %v1691_v13 }
 0x202   : > { %1333 = vmatprep.subr.mxu0 %v1535_v4 }
 0x203   : > { %1334 = vmatpush3.msra.mxu0 %v1700_v14 }
 0x204   : > { %1335 = vmatprep.subr.mxu0 %v1535_v4 }
 0x205   : > { %1336 = vmatpush3.msra.mxu0 %v1709_v15 }
 0x206   : > { %1337 = vmatprep.subr.mxu0 %v1535_v4 }
 0x207   : > { %1338 = vmatpush3.msra.mxu0 %v1718_v16 }
 0x208   : > { %1339 = vmatprep.subr.mxu0 %v1535_v4 }
 0x209   : > { %1340 = vmatpush3.msra.mxu0 %v1727_v17 }
 0x20a   : > { %1341 = vmatprep.subr.mxu0 %v1535_v4 }
 0x20b   : > { %1342 = vmatpush3.msra.mxu0 %v1736_v18 }
 0x20c   : > { %1343 = vmatprep.subr.mxu0 %v1535_v4 }
 0x20d   : > { %1344 = vmatpush3.msra.mxu0 %v1745_v19 }
 0x20e   : > { %1383 = vmatprep.subr.mxu0 %v1535_v4 }
 0x2ae   : > { %v476_v43 = vpop.f32.mrf.mxu0 }
 0x2af   : > { %v481_v44 = vrot.slane %v476_v43, 6  ;;  %v482_v45 = vrot.slane %v476_v43, 7 }
 0x2b0   : > { %v1277_v46 = vpop.f32.mrf.mxu0 }
 0x2b1   : > { %v485_v47 = vadd.f32 %v481_v44, %v1795_v21  ;;  %v486_v48 = vadd.f32 %v482_v45, %v1799_v22 }
 0x2b3   : > { %1487 = vtanh.f32 %v485_v47 }
 0x2b4   : > { %1489 = vtanh.f32 %v486_v48 }
 0x2c0   : > { %v1488_v49 = vpop.eup %1487 }
 0x2c1   : > { %v1490_v50 = vpop.eup %1489  ;;  %v497_v51 = vrot.slane %v1488_v49, 2 }
 0x2c2   : > { %v491_v52 = vrot.slane %v1490_v50, 7  ;;  %v498_v53 = vrot.slane %v1490_v50, 1 }
 0x2c4   : > { %v493_v54 = vsel %vm492_vm3, %v491_v52, %v1488_v49  ;;  %v499_v55 = vsel %vm317_vm1, %v498_v53, %v497_v51 }
 0x2c5   : > { %1028 = vst [vmem:[%s1601_s6 + $0x2] sm:$0xc] %v493_v54  ;;  %1311 = vmatmul.mubr.f32.vlgmr.msra.gmra.mxu1 %v499_v55 }
 0x2c6   : > { %1349 = vmatpush3.msra.mxu1 %v1612_v3  ;;  %1380 = vmatprep.mubr.msk.f32.mxu1 %vm1536_vm0, %v1535_v4 }
 0x2c7   : > { %1350 = vmatprep.subr.mxu1 %v1535_v4 }
 0x2c8   : > { %1351 = vmatpush3.msra.mxu1 %v1618_v5 }
 0x2c9   : > { %1352 = vmatprep.subr.mxu1 %v1535_v4 }
 0x2ca   : > { %1353 = vmatpush3.msra.mxu1 %v1628_v6 }
 0x2cb   : > { %1354 = vmatprep.subr.mxu1 %v1535_v4 }
 0x2cc   : > { %1355 = vmatpush3.msra.mxu1 %v1637_v7 }
 0x2cd   : > { %1356 = vmatprep.subr.mxu1 %v1535_v4 }
 0x2ce   : > { %1357 = vmatpush3.msra.mxu1 %v1646_v8 }
 0x2cf   : > { %1358 = vmatprep.subr.mxu1 %v1535_v4 }
 0x2d0   : > { %1359 = vmatpush3.msra.mxu1 %v1655_v9 }
 0x2d1   : > { %1360 = vmatprep.subr.mxu1 %v1535_v4 }
 0x2d2   : > { %1361 = vmatpush3.msra.mxu1 %v1664_v10 }
 0x2d3   : > { %1362 = vmatprep.subr.mxu1 %v1535_v4 }
 0x2d4   : > { %1363 = vmatpush3.msra.mxu1 %v1673_v11 }
 0x2d5   : > { %1364 = vmatprep.subr.mxu1 %v1535_v4 }
 0x2d6   : > { %1365 = vmatpush3.msra.mxu1 %v1682_v12 }
 0x2d7   : > { %1366 = vmatprep.subr.mxu1 %v1535_v4 }
 0x2d8   : > { %1367 = vmatpush3.msra.mxu1 %v1691_v13 }
 0x2d9   : > { %1368 = vmatprep.subr.mxu1 %v1535_v4 }
 0x2da   : > { %1369 = vmatpush3.msra.mxu1 %v1700_v14 }
 0x2db   : > { %1370 = vmatprep.subr.mxu1 %v1535_v4 }
 0x2dc   : > { %1371 = vmatpush3.msra.mxu1 %v1709_v15 }
 0x2dd   : > { %1372 = vmatprep.subr.mxu1 %v1535_v4 }
 0x2de   : > { %1373 = vmatpush3.msra.mxu1 %v1718_v16 }
 0x2df   : > { %1374 = vmatprep.subr.mxu1 %v1535_v4 }
 0x2e0   : > { %1375 = vmatpush3.msra.mxu1 %v1727_v17 }
 0x2e1   : > { %1376 = vmatprep.subr.mxu1 %v1535_v4 }
 0x2e2   : > { %1377 = vmatpush3.msra.mxu1 %v1736_v18 }
 0x2e3   : > { %1378 = vmatprep.subr.mxu1 %v1535_v4 }
 0x2e4   : > { %1379 = vmatpush3.msra.mxu1 %v1745_v19 }
 0x2e5   : > { %1418 = vmatprep.subr.mxu1 %v1535_v4 }
 0x385   : > { %v567_v56 = vpop.f32.mrf.mxu1 }
 0x386   : > { %v572_v57 = vrot.slane %v567_v56, 5  ;;  %v573_v58 = vrot.slane %v567_v56, 6 }
 0x387   : > { %v1312_v59 = vpop.f32.mrf.mxu1 }
 0x388   : > { %v576_v60 = vadd.f32 %v572_v57, %v1795_v21  ;;  %v577_v61 = vadd.f32 %v573_v58, %v1799_v22 }
 0x38a   : > { %1491 = vtanh.f32 %v576_v60 }
 0x38b   : > { %1493 = vtanh.f32 %v577_v61 }
 0x397   : > { %v1492_v62 = vpop.eup %1491 }
 0x398   : > { %v1494_v63 = vpop.eup %1493  ;;  %v588_v0 = vrot.slane %v1492_v62, 3 }
 0x399   : > { %v582_v1 = vrot.slane %v1494_v63, 7  ;;  %v589_v2 = vrot.slane %v1494_v63, 2 }
 0x39b   : > { %v584_v20 = vsel %vm583_vm4, %v582_v1, %v1492_v62  ;;  %v590_v23 = vsel %vm317_vm1, %v589_v2, %v588_v0 }
 0x39c   : > { %1029 = vst [vmem:[%s1601_s6 + $0x3] sm:$0x18] %v584_v20  ;;  %1346 = vmatmul.mubr.f32.vlgmr.msra.gmra.mxu0 %v590_v23 }
 0x39d   : > { %1384 = vmatpush3.msra.mxu0 %v1612_v3  ;;  %1415 = vmatprep.mubr.msk.f32.mxu0 %vm1536_vm0, %v1535_v4 }
 0x39e   : > { %1385 = vmatprep.subr.mxu0 %v1535_v4 }
 0x39f   : > { %1386 = vmatpush3.msra.mxu0 %v1618_v5 }
 0x3a0   : > { %1387 = vmatprep.subr.mxu0 %v1535_v4 }
 0x3a1   : > { %1388 = vmatpush3.msra.mxu0 %v1628_v6 }
 0x3a2   : > { %1389 = vmatprep.subr.mxu0 %v1535_v4 }
 0x3a3   : > { %1390 = vmatpush3.msra.mxu0 %v1637_v7 }
 0x3a4   : > { %1391 = vmatprep.subr.mxu0 %v1535_v4 }
 0x3a5   : > { %1392 = vmatpush3.msra.mxu0 %v1646_v8 }
 0x3a6   : > { %1393 = vmatprep.subr.mxu0 %v1535_v4 }
 0x3a7   : > { %1394 = vmatpush3.msra.mxu0 %v1655_v9 }
 0x3a8   : > { %1395 = vmatprep.subr.mxu0 %v1535_v4 }
 0x3a9   : > { %1396 = vmatpush3.msra.mxu0 %v1664_v10 }
 0x3aa   : > { %1397 = vmatprep.subr.mxu0 %v1535_v4 }
 0x3ab   : > { %1398 = vmatpush3.msra.mxu0 %v1673_v11 }
 0x3ac   : > { %1399 = vmatprep.subr.mxu0 %v1535_v4 }
 0x3ad   : > { %1400 = vmatpush3.msra.mxu0 %v1682_v12 }
 0x3ae   : > { %1401 = vmatprep.subr.mxu0 %v1535_v4 }
 0x3af   : > { %1402 = vmatpush3.msra.mxu0 %v1691_v13 }
 0x3b0   : > { %1403 = vmatprep.subr.mxu0 %v1535_v4 }
 0x3b1   : > { %1404 = vmatpush3.msra.mxu0 %v1700_v14 }
 0x3b2   : > { %1405 = vmatprep.subr.mxu0 %v1535_v4 }
 0x3b3   : > { %1406 = vmatpush3.msra.mxu0 %v1709_v15 }
 0x3b4   : > { %1407 = vmatprep.subr.mxu0 %v1535_v4 }
 0x3b5   : > { %1408 = vmatpush3.msra.mxu0 %v1718_v16 }
 0x3b6   : > { %1409 = vmatprep.subr.mxu0 %v1535_v4 }
 0x3b7   : > { %1410 = vmatpush3.msra.mxu0 %v1727_v17 }
 0x3b8   : > { %1411 = vmatprep.subr.mxu0 %v1535_v4 }
 0x3b9   : > { %1412 = vmatpush3.msra.mxu0 %v1736_v18 }
 0x3ba   : > { %1413 = vmatprep.subr.mxu0 %v1535_v4 }
 0x3bb   : > { %1414 = vmatpush3.msra.mxu0 %v1745_v19 }
 0x45c   : > { %v658_v24 = vpop.f32.mrf.mxu0 }
 0x45d   : > { %v663_v25 = vrot.slane %v658_v24, 4  ;;  %v664_v26 = vrot.slane %v658_v24, 5 }
 0x45e   : > { %v1347_v27 = vpop.f32.mrf.mxu0 }
 0x45f   : > { %v667_v28 = vadd.f32 %v663_v25, %v1795_v21  ;;  %v668_v29 = vadd.f32 %v664_v26, %v1799_v22 }
 0x461   : > { %1495 = vtanh.f32 %v667_v28 }
 0x462   : > { %1497 = vtanh.f32 %v668_v29 }
 0x46e   : > { %v1496_v30 = vpop.eup %1495 }
 0x46f   : > { %v1498_v31 = vpop.eup %1497  ;;  %v679_v32 = vrot.slane %v1496_v30, 4 }
 0x470   : > { %v673_v33 = vrot.slane %v1498_v31, 7  ;;  %v680_v34 = vrot.slane %v1498_v31, 3 }
 0x472   : > { %v675_v35 = vsel %vm674_vm5, %v673_v33, %v1496_v30  ;;  %v681_v36 = vsel %vm317_vm1, %v680_v34, %v679_v32 }
 0x473   : > { %1030 = vst [vmem:[%s1601_s6 + $0x4] sm:$0x30] %v675_v35  ;;  %1381 = vmatmul.mubr.f32.vlgmr.msra.gmra.mxu1 %v681_v36 }
 0x474   : > { %1419 = vmatpush3.msra.mxu1 %v1612_v3  ;;  %1450 = vmatprep.mubr.msk.f32.mxu1 %vm1536_vm0, %v1535_v4 }
 0x475   : > { %1420 = vmatprep.subr.mxu1 %v1535_v4 }
 0x476   : > { %1421 = vmatpush3.msra.mxu1 %v1618_v5 }
 0x477   : > { %1422 = vmatprep.subr.mxu1 %v1535_v4 }
 0x478   : > { %1423 = vmatpush3.msra.mxu1 %v1628_v6 }
 0x479   : > { %1424 = vmatprep.subr.mxu1 %v1535_v4 }
 0x47a   : > { %1425 = vmatpush3.msra.mxu1 %v1637_v7 }
 0x47b   : > { %1426 = vmatprep.subr.mxu1 %v1535_v4 }
 0x47c   : > { %1427 = vmatpush3.msra.mxu1 %v1646_v8 }
 0x47d   : > { %1428 = vmatprep.subr.mxu1 %v1535_v4 }
 0x47e   : > { %1429 = vmatpush3.msra.mxu1 %v1655_v9 }
 0x47f   : > { %1430 = vmatprep.subr.mxu1 %v1535_v4 }
 0x480   : > { %1431 = vmatpush3.msra.mxu1 %v1664_v10 }
 0x481   : > { %1432 = vmatprep.subr.mxu1 %v1535_v4 }
 0x482   : > { %1433 = vmatpush3.msra.mxu1 %v1673_v11 }
 0x483   : > { %1434 = vmatprep.subr.mxu1 %v1535_v4 }
 0x484   : > { %1435 = vmatpush3.msra.mxu1 %v1682_v12 }
 0x485   : > { %1436 = vmatprep.subr.mxu1 %v1535_v4 }
 0x486   : > { %1437 = vmatpush3.msra.mxu1 %v1691_v13 }
 0x487   : > { %1438 = vmatprep.subr.mxu1 %v1535_v4 }
 0x488   : > { %1439 = vmatpush3.msra.mxu1 %v1700_v14 }
 0x489   : > { %1440 = vmatprep.subr.mxu1 %v1535_v4 }
 0x48a   : > { %1441 = vmatpush3.msra.mxu1 %v1709_v15 }
 0x48b   : > { %1442 = vmatprep.subr.mxu1 %v1535_v4 }
 0x48c   : > { %1443 = vmatpush3.msra.mxu1 %v1718_v16 }
 0x48d   : > { %1444 = vmatprep.subr.mxu1 %v1535_v4 }
 0x48e   : > { %1445 = vmatpush3.msra.mxu1 %v1727_v17 }
 0x48f   : > { %1446 = vmatprep.subr.mxu1 %v1535_v4 }
 0x490   : > { %1447 = vmatpush3.msra.mxu1 %v1736_v18 }
 0x491   : > { %1448 = vmatprep.subr.mxu1 %v1535_v4 }
 0x492   : > { %1449 = vmatpush3.msra.mxu1 %v1745_v19 }
 0x533   : > { %v749_v3 = vpop.f32.mrf.mxu1 }
 0x534   : > { %v754_v5 = vrot.slane %v749_v3, 3  ;;  %v755_v6 = vrot.slane %v749_v3, 4 }
 0x535   : > { %v1382_v7 = vpop.f32.mrf.mxu1 }
 0x536   : > { %v758_v8 = vadd.f32 %v754_v5, %v1795_v21  ;;  %v759_v9 = vadd.f32 %v755_v6, %v1799_v22 }
 0x538   : > { %1499 = vtanh.f32 %v758_v8 }
 0x539   : > { %1501 = vtanh.f32 %v759_v9 }
 0x545   : > { %v1500_v10 = vpop.eup %1499 }
 0x546   : > { %v1502_v11 = vpop.eup %1501  ;;  %v770_v12 = vrot.slane %v1500_v10, 5 }
 0x547   : > { %v764_v13 = vrot.slane %v1502_v11, 7  ;;  %v771_v14 = vrot.slane %v1502_v11, 4 }
 0x549   : > { %v766_v4 = vsel %vm765_vm6, %v764_v13, %v1500_v10  ;;  %v772_v15 = vsel %vm317_vm1, %v771_v14, %v770_v12 }
 0x54a   : > { %1031 = vst [vmem:[%s1601_s6 + $0x5] sm:$0x60] %v766_v4  ;;  %1416 = vmatmul.mubr.f32.vlgmr.msra.gmra.mxu0 %v772_v15 }
 0x60a   : > { %v840_v16 = vpop.f32.mrf.mxu0 }
 0x60b   : > { %v845_v17 = vrot.slane %v840_v16, 2  ;;  %v846_v18 = vrot.slane %v840_v16, 3 }
 0x60c   : > { %v1417_v19 = vpop.f32.mrf.mxu0 }
 0x60d   : > { %v849_v37 = vadd.f32 %v845_v17, %v1795_v21  ;;  %v850_v38 = vadd.f32 %v846_v18, %v1799_v22 }
 0x60f   : > { %1503 = vtanh.f32 %v849_v37 }
 0x610   : > { %1505 = vtanh.f32 %v850_v38 }
 0x61c   : > { %v1504_v39 = vpop.eup %1503 }
 0x61d   : > { %v1506_v40 = vpop.eup %1505  ;;  %v861_v41 = vrot.slane %v1504_v39, 6 }
 0x61e   : > { %v855_v42 = vrot.slane %v1506_v40, 7  ;;  %v862_v43 = vrot.slane %v1506_v40, 5 }
 0x620   : > { %v857_v44 = vsel %vm856_vm7, %v855_v42, %v1504_v39  ;;  %v863_v45 = vsel %vm317_vm1, %v862_v43, %v861_v41 }
 0x621   : > { %1032 = vst [vmem:[%s1601_s6 + $0x6] sm:$0xc0] %v857_v44  ;;  %1451 = vmatmul.mubr.f32.vlgmr.msra.gmra.mxu1 %v863_v45 }
 0x6e1   : > { %v931_v46 = vpop.f32.mrf.mxu1 }
 0x6e2   : > { %v936_v47 = vrot.slane %v931_v46, 1  ;;  %v937_v48 = vrot.slane %v931_v46, 2 }
 0x6e3   : > { %v1452_v49 = vpop.f32.mrf.mxu1 }
 0x6e4   : > { %v940_v50 = vadd.f32 %v936_v47, %v1795_v21  ;;  %v941_v51 = vadd.f32 %v937_v48, %v1799_v22 }
 0x6e6   : > { %1507 = vtanh.f32 %v940_v50 }
 0x6e7   : > { %1509 = vtanh.f32 %v941_v51 }
 0x6f3   : > { %v1508_v52 = vpop.eup %1507 }
 0x6f4   : > { %v1510_v53 = vpop.eup %1509  ;;  %1033 = vst [vmem:[%s1601_s6 + $0x7] sm:$0x80] %v1508_v52  ;;  %952 = vst [vmem:[#allocation2 - $0x7] sm:$0x80] %v1508_v52 }
 0x6f5   : > { %v946_v54 = vrot.slane %v1510_v53, 7 }
 0x6f7   : > { %1034 = vst [vmem:[%s1601_s6 + $0xf] sm:$0x1] %v946_v54  ;;  %953 = vst [vmem:[#allocation2 + $0x1] sm:$0x1] %v946_v54 }
 0x6f8 PF: > { %p10_p10 = scmp.ge.s32.totalorder %s1574_s16, 4   ;;  %s2015_s12 = smov %s1529_s13 }
 0x6f9   : > { %s2016_s13 = smov %s1583_s19  ;;  %s2017_s14 = smov %s1574_s16 }
 0x6fa   :  { %12 = sbr.rel (!%p10_p10) target bundleno = 2 (0x2), region = 116 }

// kernel: rnn_forward.5
= control target key start
LH: loop header
LB: loop body
LE: loop exit
PB: predicated region body
PF: predicated region fallthrough
CT: control target
= control target key end

     0   :  { %s372_s0 = inlined_call_operand.vmem [shape: f32[32,128], index: 0, kind: input, shape index: {}]   ;;  %s373_s1 = inlined_call_operand.vmem [shape: f32[128,256], index: 1, kind: input, shape index: {}]   ;;  %s374_s2 = inlined_call_operand.vmem [shape: f32[1,256], index: 2, kind: input, shape index: {}]   ;;  %s375_s3 = inlined_call_operand.hbm [shape: f32[32,256], index: 3, kind: output, shape index: {}]  }
   0x1   :  { %v50_v0 = vld [vmem:[%s373_s1 + $0xf8] sm:$0xff]  ;;  %v49_v1 = vld [vmem:[%s373_s1 + $0xf0] sm:$0xff]  ;;  %v48_v2 = vld [vmem:[%s373_s1 + $0xe8] sm:$0xff] }
   0x2   :  { %63 = vmatprep.subr.mxu0 %v50_v0  ;;  %176 = vmatprep.subr.mxu1 %v50_v0  ;;  %v47_v3 = vld [vmem:[%s373_s1 + $0xe0] sm:$0xff]  ;;  %v46_v4 = vld [vmem:[%s373_s1 + $0xd8] sm:$0xff]  ;;  %v45_v5 = vld [vmem:[%s373_s1 + $0xd0] sm:$0xff] }
   0x3   :  { %64 = vmatpush1.msra.mxu0 %v49_v1  ;;  %192 = vmatpush1.msra.mxu1 %v49_v1  ;;  %v44_v6 = vld [vmem:[%s373_s1 + $0xc8] sm:$0xff]  ;;  %v43_v7 = vld [vmem:[%s373_s1 + $0xc0] sm:$0xff]  ;;  %v42_v8 = vld [vmem:[%s373_s1 + $0xb8] sm:$0xff] }
   0x4   :  { %65 = vmatprep.subr.mxu0 %v48_v2  ;;  %177 = vmatprep.subr.mxu1 %v48_v2  ;;  %v41_v9 = vld [vmem:[%s373_s1 + $0xb0] sm:$0xff]  ;;  %v40_v10 = vld [vmem:[%s373_s1 + $0xa8] sm:$0xff]  ;;  %v39_v11 = vld [vmem:[%s373_s1 + $0xa0] sm:$0xff] }
   0x5   :  { %66 = vmatpush1.msra.mxu0 %v47_v3  ;;  %193 = vmatpush1.msra.mxu1 %v47_v3  ;;  %v38_v12 = vld [vmem:[%s373_s1 + $0x98] sm:$0xff]  ;;  %v37_v13 = vld [vmem:[%s373_s1 + $0x90] sm:$0xff]  ;;  %v36_v14 = vld [vmem:[%s373_s1 + $0x88] sm:$0xff] }
   0x6   :  { %67 = vmatprep.subr.mxu0 %v46_v4  ;;  %178 = vmatprep.subr.mxu1 %v46_v4 }
   0x7   :  { %68 = vmatpush1.msra.mxu0 %v45_v5  ;;  %194 = vmatpush1.msra.mxu1 %v45_v5 }
   0x8   :  { %69 = vmatprep.subr.mxu0 %v44_v6  ;;  %179 = vmatprep.subr.mxu1 %v44_v6 }
   0x9   :  { %70 = vmatpush1.msra.mxu0 %v43_v7  ;;  %195 = vmatpush1.msra.mxu1 %v43_v7 }
   0xa   :  { %71 = vmatprep.subr.mxu0 %v42_v8  ;;  %180 = vmatprep.subr.mxu1 %v42_v8 }
   0xb   :  { %72 = vmatpush1.msra.mxu0 %v41_v9  ;;  %196 = vmatpush1.msra.mxu1 %v41_v9 }
   0xc   :  { %73 = vmatprep.subr.mxu0 %v40_v10  ;;  %181 = vmatprep.subr.mxu1 %v40_v10 }
   0xd   :  { %74 = vmatpush1.msra.mxu0 %v39_v11  ;;  %197 = vmatpush1.msra.mxu1 %v39_v11 }
   0xe   :  { %8 = vsyncpa [#allocation3], 0  ;;  %75 = vmatprep.subr.mxu0 %v38_v12  ;;  %182 = vmatprep.subr.mxu1 %v38_v12  ;;  %v35_v15 = vld [vmem:[%s373_s1 + $0x80] sm:$0xff]  ;;  %v34_v16 = vld [vmem:[%s373_s1 + $0x78] sm:$0xff]  ;;  %v234_v34 = vmov 0.0   ;;  %v53_v37 = vlaneseq }
   0xf   :  { %76 = vmatpush1.msra.mxu0 %v37_v13  ;;  %198 = vmatpush1.msra.mxu1 %v37_v13  ;;  %v33_v17 = vld [vmem:[%s373_s1 + $0x70] sm:$0xff]  ;;  %v32_v18 = vld [vmem:[%s373_s1 + $0x68] sm:$0xff]  ;;  %v31_v19 = vld [vmem:[%s373_s1 + $0x60] sm:$0xff] }
  0x10   :  { %77 = vmatprep.subr.mxu0 %v36_v14  ;;  %183 = vmatprep.subr.mxu1 %v36_v14  ;;  %v30_v20 = vld [vmem:[%s373_s1 + $0x58] sm:$0xff]  ;;  %v29_v21 = vld [vmem:[%s373_s1 + $0x50] sm:$0xff]  ;;  %v28_v22 = vld [vmem:[%s373_s1 + $0x48] sm:$0xff]  ;;  %v54_v38 = vshrl.u32 %v53_v37, 7 }
  0x11   :  { %78 = vmatpush1.msra.mxu0 %v35_v15  ;;  %199 = vmatpush1.msra.mxu1 %v35_v15  ;;  %v27_v23 = vld [vmem:[%s373_s1 + $0x40] sm:$0xff]  ;;  %v26_v24 = vld [vmem:[%s373_s1 + $0x38] sm:$0xff]  ;;  %v25_v25 = vld [vmem:[%s373_s1 + $0x30] sm:$0xff] }
  0x12   :  { %79 = vmatprep.subr.mxu0 %v34_v16  ;;  %184 = vmatprep.subr.mxu1 %v34_v16  ;;  %v24_v26 = vld [vmem:[%s373_s1 + $0x28] sm:$0xff]  ;;  %v23_v27 = vld [vmem:[%s373_s1 + $0x20] sm:$0xff]  ;;  %v22_v28 = vld [vmem:[%s373_s1 + $0x18] sm:$0xff]  ;;  %v55_v39 = vsub.s32 0, %v54_v38  ;;  %v59_v41 = vsub.s32 1, %v54_v38 }
  0x13   :  { %80 = vmatpush1.msra.mxu0 %v33_v17  ;;  %200 = vmatpush1.msra.mxu1 %v33_v17  ;;  %v21_v29 = vld [vmem:[%s373_s1 + $0x10] sm:$0xff]  ;;  %v20_v30 = vld [vmem:[%s373_s1 + $0x8] sm:$0xff]  ;;  %v19_v31 = vld [vmem:[%s373_s1] sm:$0xff] }
  0x14   :  { %81 = vmatprep.subr.mxu0 %v32_v18  ;;  %185 = vmatprep.subr.mxu1 %v32_v18  ;;  %v15_v32 = vld [vmem:[%s372_s0] sm:$0xff]  ;;  %v17_v33 = vld [vmem:[%s372_s0 + $0x10] sm:$0xff]  ;;  %v16_v35 = vld [vmem:[%s372_s0 + $0x8] sm:$0xff] }
  0x15   :  { %82 = vmatpush1.msra.mxu0 %v31_v19  ;;  %201 = vmatpush1.msra.mxu1 %v31_v19  ;;  %v18_v36 = vld [vmem:[%s372_s0 + $0x18] sm:$0xff]  ;;  %v51_v40 = vld [vmem:[%s374_s2] sm:$0x3]  ;;  %s235_s0 = smov [#allocation2]  }
  0x16   :  { %83 = vmatprep.subr.mxu0 %v30_v20  ;;  %186 = vmatprep.subr.mxu1 %v30_v20  ;;  %v56_v42 = vrot.slane %v51_v40, %v55_v39  ;;  %v60_v43 = vrot.slane %v51_v40, %v59_v41  ;;  %s165_s4 = sshll.u32 %s235_s0, 4  ;;  %s166_s4 = int_to_ptr.vmem [resolvable:$true] %s165_s4 }
  0x17   :  { %84 = vmatpush1.msra.mxu0 %v29_v21  ;;  %202 = vmatpush1.msra.mxu1 %v29_v21  ;;  %s212_s2 = scalar_lea.vmem %s166_s4, 1024  ;;  %p217_p1 = scmp.lt.s32.totalorder %s166_s4, %s166_s4 }
  0x18   :  { %85 = vmatprep.subr.mxu0 %v28_v22  ;;  %187 = vmatprep.subr.mxu1 %v28_v22  ;;  %p213_p0 = scmp.ne.s32.totalorder %s166_s4, %s212_s2  ;;  %p218_p2 = scmp.lt.s32.totalorder %s212_s2, %s212_s2 }
  0x19   :  { %86 = vmatpush1.msra.mxu0 %v27_v23  ;;  %203 = vmatpush1.msra.mxu1 %v27_v23 }
  0x1a   :  { %87 = vmatprep.subr.mxu0 %v26_v24  ;;  %188 = vmatprep.subr.mxu1 %v26_v24  ;;  %p219_p3 = por %p218_p2, %p217_p1 }
  0x1b   :  { %88 = vmatpush1.msra.mxu0 %v25_v25  ;;  %204 = vmatpush1.msra.mxu1 %v25_v25 }
  0x1c   :  { %89 = vmatprep.subr.mxu0 %v24_v26  ;;  %189 = vmatprep.subr.mxu1 %v24_v26  ;;  %p220_p4 = pnand %p219_p3, %p213_p0 }
  0x1d   :  { %90 = vmatpush1.msra.mxu0 %v23_v27  ;;  %205 = vmatpush1.msra.mxu1 %v23_v27 }
  0x1e   :  { %91 = vmatprep.subr.mxu0 %v22_v28  ;;  %190 = vmatprep.subr.mxu1 %v22_v28 }
  0x1f   :  { %92 = vmatpush1.msra.mxu0 %v21_v29  ;;  %206 = vmatpush1.msra.mxu1 %v21_v29 }
  0x20   :  { %93 = vmatprep.subr.mxu0 %v20_v30  ;;  %191 = vmatprep.subr.mxu1 %v20_v30 }
  0x21   :  { %94 = vmatpush1.msra.mxu0 %v19_v31  ;;  %207 = vmatpush1.msra.mxu1 %v19_v31 }
  0x22   :  { %127 = vmatprep.mubr.f32.mxu0 %v234_v34  ;;  %139 = vmatprep.mubr.f32.mxu1 %v234_v34 }
  0x23   :  { %128 = vmatmul.mubr.f32.vlgmr.msra.gmra.mxu0 %v15_v32  ;;  %140 = vmatmul.mubr.f32.vlgmr.msra.gmra.mxu1 %v17_v33 }
  0x24   :  { %133 = vmatprep.mubr.f32.mxu0 %v234_v34  ;;  %145 = vmatprep.mubr.f32.mxu1 %v234_v34 }
  0x27   :  { %134 = vmatmul.mubr.f32.gmra.mxu0 %v16_v35  ;;  %146 = vmatmul.mubr.f32.gmra.mxu1 %v18_v36 }
  0xe3   :  { %v129_v44 = vpop.f32.mrf.mxu0  ;;  %v141_v45 = vpop.f32.mrf.mxu1 }
  0xe4   :  { %v130_v46 = vadd.f32 %v129_v44, %v56_v42  ;;  %v142_v47 = vadd.f32 %v141_v45, %v56_v42 }
  0xe5   :  { %v131_v48 = vpop.f32.mrf.mxu0  ;;  %v143_v49 = vpop.f32.mrf.mxu1 }
  0xe6   :  { %152 = vst [vmem:[#allocation2] sm:$0xff] %v130_v46  ;;  %156 = vst [vmem:[#allocation2 + $0x20] sm:$0xff] %v142_v47  ;;  %v132_v50 = vadd.f32 %v131_v48, %v60_v43  ;;  %v144_v51 = vadd.f32 %v143_v49, %v60_v43 }
  0xe7   :  { %v135_v52 = vpop.f32.mrf.mxu0  ;;  %v147_v53 = vpop.f32.mrf.mxu1 }
  0xe8   :  { %153 = vst [vmem:[#allocation2 + $0x8] sm:$0xff] %v132_v50  ;;  %157 = vst [vmem:[#allocation2 + $0x28] sm:$0xff] %v144_v51  ;;  %v136_v54 = vadd.f32 %v135_v52, %v56_v42  ;;  %v148_v55 = vadd.f32 %v147_v53, %v56_v42 }
  0xe9   :  { %v137_v56 = vpop.f32.mrf.mxu0  ;;  %v149_v57 = vpop.f32.mrf.mxu1 }
  0xea   :  { %154 = vst [vmem:[#allocation2 + $0x10] sm:$0xff] %v136_v54  ;;  %158 = vst [vmem:[#allocation2 + $0x30] sm:$0xff] %v148_v55  ;;  %v138_v58 = vadd.f32 %v137_v56, %v60_v43  ;;  %v150_v59 = vadd.f32 %v149_v57, %v60_v43 }
  0xec   :  { %155 = vst [vmem:[#allocation2 + $0x18] sm:$0xff] %v138_v58  ;;  %159 = vst [vmem:[#allocation2 + $0x38] sm:$0xff] %v150_v59 }
  0xed   :  { %223 = shalt.err (!%p220_p4)
}
  0xee   :  { %s236_s5 = smov 256   ;;  %s237_s6 = smov 16  }
  0xef   :  { %171 = dma.vmem_to_hbm [thread:$0]  %s166_s4, 1024, %s375_s3, [#allocation3], %s236_s5, %s236_s5, %s237_s6  }
  0xf0   :  { %232 = dma.done.wait [#allocation3], 1024  }
  0xf1   :  { %233 = vsyncadd [#allocation3], 4294966272 }
  0xf2   :  { %175 = vsyncpa [#allocation3], 1 }

</bundles_post_ra>
